<compile_context>
chip_gen: v6e
topology: v6e:2x2x1
jax: 0.10.0
libtpu: 0.0.40
codegen_flags: <defaults>
</compile_context>

<pallas_src>
import functools

import jax
import jax.numpy as jnp
from jax.experimental import pallas as pl
from jax.experimental.pallas import tpu as pltpu


def _fm_kernel(F, D, Vp, TB, idx_ref, off_ref, bias_ref, tt_ref, out_ref):
    """One batch tile of TB examples.

    idx_ref : (F, TB) int32   raw per-field indices (offsets NOT added yet)
    off_ref : (F,)    int32   per-field offsets, SMEM
    bias_ref: (1,)    f32     global bias, SMEM
    tt_ref  : (W, Vp) f32     rows [0:D]=E^T, [D:2D]=(E*E)^T, [2D]=lin^T, rest 0
    out_ref : (1, TB) f32     sigmoid(logit), batch on lanes (lane-dense store)
    """
    idx = idx_ref[...]                                                # (F, TB)
    vocab_iota = jax.lax.broadcasted_iota(jnp.int32, (Vp, TB), 0)     # (Vp, TB)

    # Multi-hot count matrix: Mt[v, b] = sum_f [idx[f, b] + off[f] == v].
    mt = jnp.zeros((Vp, TB), jnp.float32)
    for f in range(F):                                   # static, tiny F
        row = idx[f:f + 1, :] + off_ref[f]               # (1, TB)
        mt = mt + (vocab_iota == row).astype(jnp.float32)

    # Single MXU pass: (W, Vp) @ (Vp, TB) -> (W, TB).
    r = jnp.dot(tt_ref[...], mt, preferred_element_type=jnp.float32)

    sum_e = r[0:D, :]              # (D, TB)  sum_f e_f
    sum_e2 = r[D:2 * D, :]         # (D, TB)  sum_f e_f^2
    lin_sum = r[2 * D:2 * D + 1, :]  # (1, TB)  sum_f w_f

    # FM pairwise term: 0.5 * sum_d((sum_f e)^2 - sum_f e^2).
    ix = 0.5 * jnp.sum(sum_e * sum_e - sum_e2, axis=0, keepdims=True)  # (1, TB)

    logit = lin_sum + bias_ref[0] + ix                                 # (1, TB)
    out_ref[...] = jax.nn.sigmoid(logit)


def fm_forward(x, emb_tbl, lin_tbl, bias, offsets, *, tile_b=256):
    """x: (B, F) int32; emb_tbl: (V, D) f32; lin_tbl: (V, 1) f32;
    bias: (1,) f32; offsets: (F,) int32.  Returns (B,) f32 probabilities."""
    B, F = x.shape
    V, D = emb_tbl.shape

    # Pad vocab (matmul K) to a multiple of 128 and table width (matmul M) to
    # a multiple of 128; column layout: [E | E*E | lin | zeros].
    Vp = ((V + 127) // 128) * 128
    W = ((2 * D + 1 + 127) // 128) * 128
    tt = jnp.zeros((W, Vp), jnp.float32)
    tt = tt.at[0:D, :V].set(emb_tbl.T)
    tt = tt.at[D:2 * D, :V].set((emb_tbl * emb_tbl).T)
    tt = tt.at[2 * D, :V].set(lin_tbl[:, 0])
    # NOTE: on v6e/v7x, casting tt (and the multi-hot, which is exact) to bf16
    # would run the MXU at full rate, at the cost of ~3 significant digits.

    # Pad batch to a multiple of tile_b; batch goes on the lane axis -> (F, Bpad).
    Bpad = ((B + tile_b - 1) // tile_b) * tile_b
    x_t = jnp.zeros((F, Bpad), jnp.int32).at[:, :B].set(x.T.astype(jnp.int32))

    grid = (Bpad // tile_b,)
    kernel = functools.partial(_fm_kernel, F, D, Vp, tile_b)

    out = pl.pallas_call(
        kernel,
        out_shape=jax.ShapeDtypeStruct((1, Bpad), jnp.float32),
        grid=grid,
        in_specs=[
            # (F, tile_b) index tile, streamed per grid step.
            pl.BlockSpec((F, tile_b), lambda i: (0, i)),
            # Per-field offsets + bias: tiny scalars in SMEM.
            pl.BlockSpec(memory_space=pltpu.MemorySpace.SMEM),
            pl.BlockSpec(memory_space=pltpu.MemorySpace.SMEM),
            # Concatenated table: constant index_map -> stays VMEM resident.
            pl.BlockSpec((W, Vp), lambda i: (0, 0)),
        ],
        # Lane-dense (1, tile_b) output slab per step (unmasked vst).
        out_specs=pl.BlockSpec((1, tile_b), lambda i: (0, i)),
        compiler_params=pltpu.CompilerParams(
            dimension_semantics=("parallel",),
            # Budget: W*Vp*4 (resident table) + 2*F*tile_b*4 (idx double buffer)
            # + 2*tile_b*4 (out) + Vp*tile_b*4 (multi-hot) << 32 MiB; safe on
            # v5e/v6e/v7x scoped-VMEM defaults.
            vmem_limit_bytes=32 * 1024 * 1024,
        ),
    )(x_t, offsets.astype(jnp.int32), bias, tt)
    return out[0, :B]


def ref_forward(x, emb_tbl, lin_tbl, bias, offsets):
    """Pure-JAX reference mirroring the PyTorch FactorizationMachineModel."""
    idx = x + offsets[None, :]                      # (B, F)
    e = emb_tbl[idx]                                # (B, F, D)
    lin = lin_tbl[idx, 0]                           # (B, F)
    square_of_sum = jnp.sum(e, axis=1) ** 2         # (B, D)
    sum_of_square = jnp.sum(e * e, axis=1)          # (B, D)
    ix = 0.5 * jnp.sum(square_of_sum - sum_of_square, axis=1)   # (B,)
    logit = jnp.sum(lin, axis=1) + bias[0] + ix
    return jax.nn.sigmoid(logit)


if __name__ == "__main__":
    # Small, synthetic hyper-parameters consistent with the module.
    field_dims = (13, 7, 29, 5, 19, 3, 11, 2)       # 8 fields, vocab = 89
    embed_dim = 16
    batch = 512
    tile_b = 256                                    # 2 grid steps

    num_fields = len(field_dims)
    vocab = int(sum(field_dims))
    offsets = jnp.concatenate([
        jnp.zeros((1,), jnp.int32),
        jnp.cumsum(jnp.array(field_dims, jnp.int32))[:-1],
    ])

    key = jax.random.PRNGKey(0)
    k_emb, k_lin, k_b, k_x = jax.random.split(key, 4)

    a_emb = (6.0 / (vocab + embed_dim)) ** 0.5
    emb_tbl = jax.random.uniform(k_emb, (vocab, embed_dim), jnp.float32,
                                 minval=-a_emb, maxval=a_emb)
    a_lin = (6.0 / (vocab + 1)) ** 0.5
    lin_tbl = jax.random.uniform(k_lin, (vocab, 1), jnp.float32,
                                 minval=-a_lin, maxval=a_lin)
    bias = 0.1 * jax.random.normal(k_b, (1,), jnp.float32)

    # Input: per-field categorical indices in [0, field_dims[f]).
    cols = [
        jax.random.randint(jax.random.fold_in(k_x, f), (batch,), 0, fd,
                           dtype=jnp.int32)
        for f, fd in enumerate(field_dims)
    ]
    x = jnp.stack(cols, axis=1)                     # (batch, num_fields) int32

    out = fm_forward(x, emb_tbl, lin_tbl, bias, offsets, tile_b=tile_b)
    out = jax.block_until_ready(out)

    ref = ref_forward(x, emb_tbl, lin_tbl, bias, offsets)
    assert out.shape == (batch,)
    assert jnp.allclose(out, ref, atol=1e-5, rtol=1e-5), (out[:8], ref[:8])

    print("KERNEL_OK")
</pallas_src>

<mosaic_0001>
module attributes {stable_mosaic.version = 11 : i64} {
  func.func @_fm_kernel(%arg0: i32, %arg1: memref<8x256xi32, #tpu.memory_space<vmem>>, %arg2: memref<8xi32, #tpu.memory_space<smem>>, %arg3: memref<1xf32, #tpu.memory_space<smem>>, %arg4: memref<128x128xf32, #tpu.memory_space<vmem>>, %arg5: memref<1x256xf32, #tpu.memory_space<vmem>>) attributes {dimension_semantics = [#tpu.dimension_semantics<parallel>], iteration_bounds = array<i64: 2>, scalar_prefetch = 0 : i64, scratch_operands = 0 : i64, tpu.core_type = #tpu.core_type<tc>, window_params = [{transform_indices = @transform_0, window_bounds = array<i64: 8, 256>}, {transform_indices = @transform_1, window_bounds = array<i64: 8>}, {transform_indices = @transform_2, window_bounds = array<i64: 1>}, {pipeline_mode = #tpu.pipeline_mode<synchronous>, transform_indices = @transform_3, window_bounds = array<i64: 128, 128>}, {transform_indices = @transform_4, window_bounds = array<i64: 1, 256>}]} {
    %c0 = arith.constant 0 : index
    %c0_0 = arith.constant 0 : index
    %0 = vector.load %arg1[%c0, %c0_0] : memref<8x256xi32, #tpu.memory_space<vmem>>, vector<8x256xi32>
    %1 = tpu.iota {dimensions = array<i32: 0>} : vector<128x256xi32>
    %cst = arith.constant 0.000000e+00 : f32
    %2 = vector.broadcast %cst : f32 to vector<128x256xf32>
    %3 = vector.extract_strided_slice %0 {offsets = [0, 0], sizes = [1, 256], strides = [1, 1]} : vector<8x256xi32> to vector<1x256xi32>
    %c0_1 = arith.constant 0 : index
    %4 = memref.load %arg2[%c0_1] : memref<8xi32, #tpu.memory_space<smem>>
    %5 = vector.broadcast %4 : i32 to vector<1x256xi32>
    %6 = arith.addi %3, %5 : vector<1x256xi32>
    %7 = vector.broadcast %6 : vector<1x256xi32> to vector<128x256xi32>
    %8 = arith.cmpi eq, %1, %7 : vector<128x256xi32>
    %9 = arith.extui %8 : vector<128x256xi1> to vector<128x256xi32>
    %10 = arith.sitofp %9 : vector<128x256xi32> to vector<128x256xf32>
    %11 = arith.addf %2, %10 : vector<128x256xf32>
    %12 = vector.extract_strided_slice %0 {offsets = [1, 0], sizes = [1, 256], strides = [1, 1]} : vector<8x256xi32> to vector<1x256xi32>
    %c1 = arith.constant 1 : index
    %13 = memref.load %arg2[%c1] : memref<8xi32, #tpu.memory_space<smem>>
    %14 = vector.broadcast %13 : i32 to vector<1x256xi32>
    %15 = arith.addi %12, %14 : vector<1x256xi32>
    %16 = vector.broadcast %15 : vector<1x256xi32> to vector<128x256xi32>
    %17 = arith.cmpi eq, %1, %16 : vector<128x256xi32>
    %18 = arith.extui %17 : vector<128x256xi1> to vector<128x256xi32>
    %19 = arith.sitofp %18 : vector<128x256xi32> to vector<128x256xf32>
    %20 = arith.addf %11, %19 : vector<128x256xf32>
    %21 = vector.extract_strided_slice %0 {offsets = [2, 0], sizes = [1, 256], strides = [1, 1]} : vector<8x256xi32> to vector<1x256xi32>
    %c2 = arith.constant 2 : index
    %22 = memref.load %arg2[%c2] : memref<8xi32, #tpu.memory_space<smem>>
    %23 = vector.broadcast %22 : i32 to vector<1x256xi32>
    %24 = arith.addi %21, %23 : vector<1x256xi32>
    %25 = vector.broadcast %24 : vector<1x256xi32> to vector<128x256xi32>
    %26 = arith.cmpi eq, %1, %25 : vector<128x256xi32>
    %27 = arith.extui %26 : vector<128x256xi1> to vector<128x256xi32>
    %28 = arith.sitofp %27 : vector<128x256xi32> to vector<128x256xf32>
    %29 = arith.addf %20, %28 : vector<128x256xf32>
    %30 = vector.extract_strided_slice %0 {offsets = [3, 0], sizes = [1, 256], strides = [1, 1]} : vector<8x256xi32> to vector<1x256xi32>
    %c3 = arith.constant 3 : index
    %31 = memref.load %arg2[%c3] : memref<8xi32, #tpu.memory_space<smem>>
    %32 = vector.broadcast %31 : i32 to vector<1x256xi32>
    %33 = arith.addi %30, %32 : vector<1x256xi32>
    %34 = vector.broadcast %33 : vector<1x256xi32> to vector<128x256xi32>
    %35 = arith.cmpi eq, %1, %34 : vector<128x256xi32>
    %36 = arith.extui %35 : vector<128x256xi1> to vector<128x256xi32>
    %37 = arith.sitofp %36 : vector<128x256xi32> to vector<128x256xf32>
    %38 = arith.addf %29, %37 : vector<128x256xf32>
    %39 = vector.extract_strided_slice %0 {offsets = [4, 0], sizes = [1, 256], strides = [1, 1]} : vector<8x256xi32> to vector<1x256xi32>
    %c4 = arith.constant 4 : index
    %40 = memref.load %arg2[%c4] : memref<8xi32, #tpu.memory_space<smem>>
    %41 = vector.broadcast %40 : i32 to vector<1x256xi32>
    %42 = arith.addi %39, %41 : vector<1x256xi32>
    %43 = vector.broadcast %42 : vector<1x256xi32> to vector<128x256xi32>
    %44 = arith.cmpi eq, %1, %43 : vector<128x256xi32>
    %45 = arith.extui %44 : vector<128x256xi1> to vector<128x256xi32>
    %46 = arith.sitofp %45 : vector<128x256xi32> to vector<128x256xf32>
    %47 = arith.addf %38, %46 : vector<128x256xf32>
    %48 = vector.extract_strided_slice %0 {offsets = [5, 0], sizes = [1, 256], strides = [1, 1]} : vector<8x256xi32> to vector<1x256xi32>
    %c5 = arith.constant 5 : index
    %49 = memref.load %arg2[%c5] : memref<8xi32, #tpu.memory_space<smem>>
    %50 = vector.broadcast %49 : i32 to vector<1x256xi32>
    %51 = arith.addi %48, %50 : vector<1x256xi32>
    %52 = vector.broadcast %51 : vector<1x256xi32> to vector<128x256xi32>
    %53 = arith.cmpi eq, %1, %52 : vector<128x256xi32>
    %54 = arith.extui %53 : vector<128x256xi1> to vector<128x256xi32>
    %55 = arith.sitofp %54 : vector<128x256xi32> to vector<128x256xf32>
    %56 = arith.addf %47, %55 : vector<128x256xf32>
    %57 = vector.extract_strided_slice %0 {offsets = [6, 0], sizes = [1, 256], strides = [1, 1]} : vector<8x256xi32> to vector<1x256xi32>
    %c6 = arith.constant 6 : index
    %58 = memref.load %arg2[%c6] : memref<8xi32, #tpu.memory_space<smem>>
    %59 = vector.broadcast %58 : i32 to vector<1x256xi32>
    %60 = arith.addi %57, %59 : vector<1x256xi32>
    %61 = vector.broadcast %60 : vector<1x256xi32> to vector<128x256xi32>
    %62 = arith.cmpi eq, %1, %61 : vector<128x256xi32>
    %63 = arith.extui %62 : vector<128x256xi1> to vector<128x256xi32>
    %64 = arith.sitofp %63 : vector<128x256xi32> to vector<128x256xf32>
    %65 = arith.addf %56, %64 : vector<128x256xf32>
    %66 = vector.extract_strided_slice %0 {offsets = [7, 0], sizes = [1, 256], strides = [1, 1]} : vector<8x256xi32> to vector<1x256xi32>
    %c7 = arith.constant 7 : index
    %67 = memref.load %arg2[%c7] : memref<8xi32, #tpu.memory_space<smem>>
    %68 = vector.broadcast %67 : i32 to vector<1x256xi32>
    %69 = arith.addi %66, %68 : vector<1x256xi32>
    %70 = vector.broadcast %69 : vector<1x256xi32> to vector<128x256xi32>
    %71 = arith.cmpi eq, %1, %70 : vector<128x256xi32>
    %72 = arith.extui %71 : vector<128x256xi1> to vector<128x256xi32>
    %73 = arith.sitofp %72 : vector<128x256xi32> to vector<128x256xf32>
    %74 = arith.addf %65, %73 : vector<128x256xf32>
    %c0_2 = arith.constant 0 : index
    %c0_3 = arith.constant 0 : index
    %75 = vector.load %arg4[%c0_2, %c0_3] : memref<128x128xf32, #tpu.memory_space<vmem>>, vector<128x128xf32>
    %cst_4 = arith.constant dense<0.000000e+00> : vector<128x256xf32>
    %76 = tpu.matmul %75, %74, %cst_4 {dimension_numbers = #tpu.dot_dimension_numbers<[1], [0], [0], [1], [0, 0, 1, 1], [], []>} : vector<128x128xf32>, vector<128x256xf32>, vector<128x256xf32> -> vector<128x256xf32>
    %77 = vector.extract_strided_slice %76 {offsets = [0, 0], sizes = [16, 256], strides = [1, 1]} : vector<128x256xf32> to vector<16x256xf32>
    %78 = vector.extract_strided_slice %76 {offsets = [16, 0], sizes = [16, 256], strides = [1, 1]} : vector<128x256xf32> to vector<16x256xf32>
    %79 = vector.extract_strided_slice %76 {offsets = [32, 0], sizes = [1, 256], strides = [1, 1]} : vector<128x256xf32> to vector<1x256xf32>
    %80 = arith.mulf %77, %77 : vector<16x256xf32>
    %81 = arith.subf %80, %78 : vector<16x256xf32>
    %cst_5 = arith.constant dense<0.000000e+00> : vector<256xf32>
    %82 = vector.multi_reduction <add>, %81, %cst_5 [0] : vector<16x256xf32> to vector<256xf32>
    %83 = vector.shape_cast %82 : vector<256xf32> to vector<1x256xf32>
    %cst_6 = arith.constant 5.000000e-01 : f32
    %84 = vector.broadcast %cst_6 : f32 to vector<1x256xf32>
    %85 = arith.mulf %84, %83 : vector<1x256xf32>
    %c0_7 = arith.constant 0 : index
    %86 = memref.load %arg3[%c0_7] : memref<1xf32, #tpu.memory_space<smem>>
    %87 = vector.broadcast %86 : f32 to vector<1x256xf32>
    %88 = arith.addf %79, %87 : vector<1x256xf32>
    %89 = arith.addf %88, %85 : vector<1x256xf32>
    %90 = arith.negf %89 : vector<1x256xf32>
    %91 = math.exp %90 : vector<1x256xf32>
    %cst_8 = arith.constant 1.000000e+00 : f32
    %92 = vector.broadcast %cst_8 : f32 to vector<1x256xf32>
    %93 = arith.addf %92, %91 : vector<1x256xf32>
    %94 = arith.divf %92, %93 : vector<1x256xf32>
    %c0_9 = arith.constant 0 : index
    %c0_10 = arith.constant 0 : index
    %95 = vector.load %arg5[%c0_9, %c0_10] : memref<1x256xf32, #tpu.memory_space<vmem>>, vector<1x256xf32>
    tpu.vector_store %arg5[%c0_9, %c0_10], %94 {strides = array<i32>} : memref<1x256xf32, #tpu.memory_space<vmem>>, vector<1x256xf32>,
    return
  }
  func.func @transform_0(%arg0: i32) -> (i32, i32) {
    %c0_i32 = arith.constant 0 : i32
    %c0_i32_0 = arith.constant 0 : i32
    return %c0_i32, %arg0 : i32, i32
  }
  func.func @transform_1(%arg0: i32) -> i32 {
    %c0_i32 = arith.constant 0 : i32
    %c0_i32_0 = arith.constant 0 : i32
    return %c0_i32 : i32
  }
  func.func @transform_2(%arg0: i32) -> i32 {
    %c0_i32 = arith.constant 0 : i32
    %c0_i32_0 = arith.constant 0 : i32
    return %c0_i32 : i32
  }
  func.func @transform_3(%arg0: i32) -> (i32, i32) {
    %c0_i32 = arith.constant 0 : i32
    %c0_i32_0 = arith.constant 0 : i32
    %c0_i32_1 = arith.constant 0 : i32
    return %c0_i32, %c0_i32_0 : i32, i32
  }
  func.func @transform_4(%arg0: i32) -> (i32, i32) {
    %c0_i32 = arith.constant 0 : i32
    %c0_i32_0 = arith.constant 0 : i32
    return %c0_i32, %arg0 : i32, i32
  }
}

</mosaic_0001>

<bundles_post_ra>
// kernel: tpu_custom_call.1
= control target key start
LH: loop header
LB: loop body
LE: loop exit
PB: predicated region body
PF: predicated region fallthrough
CT: control target
= control target key end

     0   :  { %s3497_s0 = inlined_call_operand.hbm [shape: s32[8,512], index: 0, kind: input, shape index: {}]   ;;  %s3498_s1 = inlined_call_operand.vmem [shape: s32[8], index: 1, kind: input, shape index: {}]   ;;  %s3499_s2 = inlined_call_operand.<no memory space> [shape: f32[1], index: 2, kind: input, shape index: {}]   ;;  %s3500_s3 = inlined_call_operand.hbm [shape: f32[128,128], index: 3, kind: input, shape index: {}]   ;;  %s3501_s4 = inlined_call_operand.hbm [shape: f32[1,512], index: 4, kind: output, shape index: {}]  }
   0x1   :  { %9 = sst [smem:[#allocation2]] %s3499_s2 }
   0x2   :  { %10 = vsyncpa [#allocation4], 0 }
   0x3   :  { %12 = vsyncpa [#allocation4 + $0x1], 0 }
   0x4   :  { %13 = vsyncpa [#allocation6], 0 }
   0x5   :  { %14 = vsyncpa [#allocation9], 0 }
   0x6   :  { %15 = vsyncpa [#allocation5], 0 }
   0x7   :  { %17 = vsyncpa [#allocation5 + $0x1], 0  ;;  %s2287_s17 = smov 0   ;;  %s2289_s18 = smov 0  }
   0x8   :  { %s2291_s19 = smov 0   ;;  %s2293_s20 = smov 0  }
   0x9 LB: > { %s2308_s2 = sadd.s32 4294967295, %s2249_s20   ;;  %s1712_s21 = sadd.s32 4294967294, %s2249_s20   ;;  %s2249_s20 = sphi %s2293_s20, %s3525_s20   ;;  %s2245_s19 = sphi %s2291_s19, %s3524_s19   ;;  %s2241_s18 = sphi %s2289_s18, %s3523_s18   ;;  %s2237_s17 = sphi %s2287_s17, %s3522_s17  }
   0xa   : > { %p43_p0 = scmp.ne.s32.totalorder %s2241_s18, %s2237_s17  ;;  %p3502_p1 = scmp.eq.s32.totalorder %s2308_s2, 0 }
   0xb   : > { %p136_p3 = scmp.eq.s32.totalorder %s1712_s21, 1  ;;  %p1713_p5 = scmp.ge.s32.totalorder %s2249_s20, 1 }
   0xc   : > { %p2317_p4 = por %p3502_p1, %p43_p0  ;;  %p143_p7 = scmp.lt.s32.totalorder %s2249_s20, 3 }
   0xd   : > { %p2322_p6 = por %p136_p3, %p43_p0  ;;  %s156_s26 = sshll.u32 %s3498_s1, 4  ;;  %s157_s26 = int_to_ptr.vmem [resolvable:$true] %s156_s26 }
   0xe   : > { %s3506_s22 = scalar_select %p2317_p4, 1, 0 }
   0xf   : > { %s3507_s23 = scalar_select %p2322_p6, 1, 0 }
  0x10   : > { %p2330_p8 = pnand %p1713_p5, %p143_p7  ;;  %s2251_s28 = smov [#allocation8]  }
  0x11   : > { %s169_s29 = sshll.u32 %s2251_s28, 4  ;;  %s2108_s5 = scalar_lea.vmem %s157_s26, 16  ;;  %s170_s29 = int_to_ptr.vmem [resolvable:$true] %s169_s29 }
  0x12   : > { %s3508_s27 = scalar_select %p2330_p8, 1, 0 }
  0x13   : > { %p2041_p10 = pneg %p2330_p8  ;;  %p2109_p12 = scmp.ne.s32.totalorder %s157_s26, %s2108_s5 }
  0x14   : > { %p2116_p5 = scmp.lt.s32.totalorder %s157_s26, %s157_s26  ;;  %p2117_p7 = scmp.lt.s32.totalorder %s2108_s5, %s2108_s5 }
  0x15   : > { %p2339_p11 = pnand %p2041_p10, %p3502_p1 }
  0x16   : > { %p2118_p9 = por %p2117_p7, %p2116_p5 }
  0x17   : > { %p2110_p13 = pneg %p2339_p11 }
  0x19   : > { %p2111_p0 = pnand %p2110_p13, %p2109_p12 }
  0x1b   : > { %p2112_p3 = pneg %p2111_p0 }
  0x1d   : > { %p2119_p2 = pnand %p2118_p9, %p2112_p3 }
  0x1f   : > { %2122 = shalt.err (!%p2119_p2)
}
  0x20   : > { %s2252_s6 = smov [#allocation7]   ;;  %s2134_s7 = scalar_lea.vmem %s170_s29, 2048 }
  0x21   : > { %2044 = dma.vmem_to_smem (!%p2339_p11), %s157_s26, 16, %s2252_s6, [#allocation6]  }
  0x22   : > { %p2135_p10 = scmp.ne.s32.totalorder %s170_s29, %s2134_s7  ;;  %p2142_p4 = scmp.lt.s32.totalorder %s170_s29, %s170_s29 }
  0x23   : > { %p2143_p8 = scmp.lt.s32.totalorder %s2134_s7, %s2134_s7 }
  0x24   : > { %p2137_p1 = pnand %p2135_p10, %p2110_p13 }
  0x25   : > { %p2144_p12 = por %p2143_p8, %p2142_p4 }
  0x26   : > { %p2138_p6 = pneg %p2137_p1 }
  0x28   : > { %p2145_p0 = pnand %p2144_p12, %p2138_p6 }
  0x2a   : > { %2148 = shalt.err (!%p2145_p0)
}
  0x2b   : > { %s2253_s8 = smov 128   ;;  %s2254_s9 = smov 8  }
  0x2c   : > { %2047 = dma.hbm_to_vmem [thread:$0]  (!%p2339_p11), %s3500_s3, 2048, %s170_s29, [#allocation9], %s2253_s8, %s2253_s8, %s2254_s9  }
  0x2d   : > { %s2353_s12 = sadd.s32 1, %s2249_s20   ;;  %s30_s13 = sadd.s32 1, %s2245_s19 }
  0x2e   : > { %s27_s14 = ssub.s32 %s2249_s20, %s2353_s12  ;;  %p37_p1 = scmp.ne.s32.totalorder %s2245_s19, %s2241_s18 }
  0x2f   : > { %p28_p2 = scmp.eq.s32.totalorder %s27_s14, 0  ;;  %p38_p4 = scmp.eq.s32.totalorder %s2249_s20, 0 }
  0x30   : > { %p3510_p6 = scmp.eq.s32.totalorder %s2308_s2, 1  ;;  %p2058_p9 = scmp.lt.s32.totalorder %s2249_s20, 2 }
  0x31   : > { %s2369_s16 = scalar_select %p28_p2, %s2245_s19, %s30_s13  }
  0x32   : > { %p2363_p8 = por %p3510_p6, %p37_p1  ;;  %p39_p13 = por %p38_p4, %p37_p1 }
  0x33   : > { %s183_s21 = sand.u32 1, %s2245_s19   ;;  %s1995_s25 = sshll.u32 %s2249_s20, 8 }
  0x34   : > { %s3511_s15 = scalar_select %p2363_p8, 1, 0 }
  0x35   : > { %s1717_s24 = sshll.u32 %s183_s21, 4  ;;  %s2376_s29 = scalar_lea.hbm %s3497_s0, %s1995_s25 }
  0x36   : > { %s187_s30 = scalar_lea.vmem [#allocation3], %s1717_s24  ;;  %p2378_p11 = pnand %p2058_p9, %p39_p13 }
  0x37   : > { %s195_s5 = sshll.u32 %s187_s30, 4  ;;  %s184_s7 = scalar_lea.sflag [#allocation4], %s183_s21  ;;  %s196_s5 = int_to_ptr.vmem [resolvable:$true] %s195_s5 }
  0x38   : > { %s2149_s8 = scalar_lea.hbm %s2376_s29, 256  ;;  %p2151_p5 = pneg %p2378_p11 }
  0x39   : > { %p2150_p3 = scmp.ne.s32.totalorder %s2376_s29, %s2149_s8  ;;  %s2154_s11 = scalar_lea.hbm %s3497_s0, 512 }
  0x3a   : > { %p2155_p12 = scmp.lt.s32.totalorder %s2376_s29, %s3497_s0  ;;  %p2156_p0 = scmp.lt.s32.totalorder %s2154_s11, %s2149_s8 }
  0x3b   : > { %p2152_p7 = pnand %p2151_p5, %p2150_p3 }
  0x3c   : > { %p2157_p1 = por %p2156_p0, %p2155_p12 }
  0x3d   : > { %p2153_p10 = pneg %p2152_p7 }
  0x3f   : > { %p2158_p2 = pnand %p2157_p1, %p2153_p10 }
  0x41   : > { %2161 = shalt.err (!%p2158_p2)
}
  0x42   : > { %s2162_s24 = scalar_lea.vmem %s196_s5, 256  ;;  %s2255_s21 = smov [#allocation3]  }
  0x43   : > { %p2163_p4 = scmp.ne.s32.totalorder %s196_s5, %s2162_s24  ;;  %s2167_s25 = sshll.u32 %s2255_s21, 4  ;;  %s2168_s25 = int_to_ptr.vmem [resolvable:$false] %s2167_s25 }
  0x44   : > { %s2169_s26 = scalar_lea.vmem %s2168_s25, 512  ;;  %p2170_p13 = scmp.lt.s32.totalorder %s196_s5, %s2168_s25 }
  0x45   : > { %p2165_p6 = pnand %p2163_p4, %p2151_p5  ;;  %p2171_p3 = scmp.lt.s32.totalorder %s2169_s26, %s2162_s24 }
  0x47   : > { %p2166_p9 = pneg %p2165_p6  ;;  %p2172_p7 = por %p2171_p3, %p2170_p13 }
  0x49   : > { %p2173_p8 = pnand %p2172_p7, %p2166_p9 }
  0x4b   : > { %2176 = shalt.err (!%p2173_p8)
}
  0x4c   : > { %2051 = dma.hbm_to_vmem [thread:$0]  (!%p2378_p11), %s2376_s29, 256, %s196_s5, %s184_s7  }
  0x4d   : > { %p3513_p10 = scmp.ne.s32.totalorder %s3508_s27, 0 }
  0x4e   : > { %s2399_s28 = sand.u32 (!%p3513_p10), 1, %s2241_s18   ;;  %p3514_p5 = scmp.ne.s32.totalorder (!%p3513_p10), %s3506_s22, 0 }
  0x4f   : > { %204 = sbr.rel (%p3513_p10) target bundleno = 585 (0x249), region = 36  ;;  %s1721_s30 = sshll.u32 (!%p3513_p10), %s2399_s28, 4 }
  0x50   : > { %s207_s8 = scalar_lea.sflag (!%p3513_p10), [#allocation4], %s2399_s28  ;;  %s210_s9 = scalar_lea.vmem (!%p3513_p10), [#allocation3], %s1721_s30 }
  0x54   : > { %2220 = dma.done.wait (%p3514_p5), %s207_s8, 256  }
  0x55   : > { %2222 = vsyncadd (%p3514_p5), %s207_s8, 4294967040  ;;  %p3515_p8 = scmp.eq.s32.totalorder %s2308_s2, 0 }
  0x57   : > { %2224 = dma.done.wait (%p3515_p8), [#allocation6], 16   ;;  %p3516_p11 = pmov %p3515_p8 }
  0x58   : > { %p3517_p12 = pmov %p3515_p8 }
  0x59   : > { %2226 = vsyncadd (%p3516_p11), [#allocation6], 4294967280 }
  0x5a   : > { %2228 = dma.done.wait (%p3517_p12), [#allocation9], 2048   ;;  %p3518_p0 = pmov %p3515_p8 }
  0x5c   : > { %2230 = vsyncadd (%p3518_p0), [#allocation9], 4294965248 }
  0x5d   : > { %223 = sfence }
  0x5e   : > { %v248_v0 = vlaneseq  ;;  %s265_s27 = sld [smem:[#allocation7]]  ;;  %v2256_v1 = vmov 0.0   ;;  %v247_v3 = vld [vmem:[%s210_s9 + $0x8] sm:$0xff]  ;;  %v2430_v6 = vld [vmem:[%s210_s9] sm:$0xff]  ;;  %s1724_s14 = sshll.u32 %s2399_s28, 1 }
  0x5f   : > { %s1757_s29 = sld [smem:[#allocation7 + $0x1]]  ;;  %1465 = vmatprep.mubr.f32.mxu0 %v2256_v1  ;;  %1507 = vmatprep.mubr.f32.mxu1 %v2256_v1  ;;  %s1996_s24 = sshll.u32 %s2308_s2, 5 }
  0x60   : > { %v2418_v2 = vshrl.u32 %v248_v0, 7  ;;  %s2420_s22 = sld [smem:[#allocation7 + $0x2]]  ;;  %s243_s21 = scalar_lea.vmem [#allocation10], %s1724_s14 }
  0x61   : > { %s2422_s5 = sld [smem:[#allocation7 + $0x3]]  ;;  %s1620_s25 = sshll.u32 %s243_s21, 4  ;;  %s1621_s25 = int_to_ptr.vmem [resolvable:$true] %s1620_s25 }
  0x62   : > { %v2425_v4 = vadd.s32 120, %v2418_v2  ;;  %v271_v5 = vsub.s32 0, %v2418_v2  ;;  %s2428_s6 = sld [smem:[#allocation7 + $0x4]]  ;;  %v411_v7 = vsub.s32 1, %v2418_v2  ;;  %v551_v8 = vsub.s32 2, %v2418_v2  ;;  %s1618_s8 = scalar_lea.hbm %s3501_s4, %s1996_s24 }
  0x63   : > { %v691_v9 = vsub.s32 3, %v2418_v2  ;;  %v831_v10 = vsub.s32 4, %v2418_v2  ;;  %s2436_s7 = sld [smem:[#allocation7 + $0x5]]  ;;  %v971_v12 = vsub.s32 5, %v2418_v2  ;;  %v1111_v13 = vsub.s32 6, %v2418_v2  ;;  %s1606_s9 = scalar_lea.sflag [#allocation5], %s2399_s28 }
  0x64   : > { %v266_v11 = vstv %s265_s27  ;;  %s2439_s10 = sld [smem:[#allocation7 + $0x6]]  ;;  %v1251_v14 = vsub.s32 7, %v2418_v2  ;;  %v2447_v18 = vadd.s32 112, %v2418_v2  ;;  %v2452_v22 = vadd.s32 104, %v2418_v2  ;;  %s2177_s27 = scalar_lea.vmem %s1621_s25, 32 }
  0x65   : > { %v268_v15 = vadd.s32 %v266_v11, %v247_v3  ;;  %v406_v16 = vstv %s1757_s29  ;;  %s2443_s11 = sld [smem:[#allocation7 + $0x7]]  ;;  %v267_v17 = vadd.s32 %v266_v11, %v2430_v6  ;;  %p2178_p1 = scmp.ne.s32.totalorder %s1621_s25, %s2177_s27 }
  0x66   : > { %v408_v19 = vadd.s32 %v406_v16, %v247_v3  ;;  %v546_v20 = vstv %s2420_s22  ;;  %v407_v21 = vadd.s32 %v406_v16, %v2430_v6  ;;  %s3456_s13 = sld [smem:[#allocation2]]  ;;  %p3519_p2 = scmp.ne.s32.totalorder %s3511_s15, 0 }
  0x67   : > { %v2454_v23 = vrot.slane %v268_v15, %v271_v5  ;;  %v548_v24 = vadd.s32 %v546_v20, %v247_v3  ;;  %v686_v25 = vstv %s2422_s5  ;;  %v2457_v26 = vrot.slane %v267_v17, %v271_v5  ;;  %s2258_s29 = smov [#allocation10]  }
  0x68   : > { %v2459_v27 = vrot.slane %v408_v19, %v411_v7  ;;  %v688_v28 = vadd.s32 %v686_v25, %v247_v3  ;;  %v826_v29 = vstv %s2428_s6  ;;  %v2462_v30 = vrot.slane %v407_v21, %v411_v7  ;;  %p2179_p4 = pnand %p2178_p1, %p3519_p2  ;;  %s2181_s2 = sshll.u32 %s2258_s29, 4  ;;  %s2182_s2 = int_to_ptr.vmem [resolvable:$false] %s2181_s2 }
  0x69   : > { %vm308_vm0 = vcmp.eq.s32.totalorder %v2425_v4, %v2454_v23  ;;  %v2468_v31 = vrot.slane %v548_v24, %v551_v8  ;;  %v828_v32 = vadd.s32 %v826_v29, %v247_v3  ;;  %v966_v33 = vstv %s2436_s7  ;;  %s2183_s22 = scalar_lea.vmem %s2182_s2, 64  ;;  %p2184_p9 = scmp.lt.s32.totalorder %s1621_s25, %s2182_s2 }
  0x6a   : > { %v1756_v34 = vsel %vm308_vm0, 1.0, %v2256_v1  ;;  %vm448_vm1 = vcmp.eq.s32.totalorder %v2425_v4, %v2459_v27  ;;  %v2476_v35 = vrot.slane %v688_v28, %v691_v9  ;;  %v968_v36 = vadd.s32 %v966_v33, %v247_v3  ;;  %p2180_p6 = pneg %p2179_p4  ;;  %p2185_p13 = scmp.lt.s32.totalorder %s2183_s22, %s2177_s27 }
  0x6b   : > { %v1789_v37 = vsel %vm448_vm1, 1.0, %v2256_v1  ;;  %vm588_vm2 = vcmp.eq.s32.totalorder %v2425_v4, %v2468_v31  ;;  %v2483_v38 = vrot.slane %v828_v32, %v831_v10  ;;  %v1106_v39 = vstv %s2439_s10 }
  0x6c   : > { %v544_v40 = vadd.f32 %v1789_v37, %v1756_v34  ;;  %v1822_v41 = vsel %vm588_vm2, 1.0, %v2256_v1  ;;  %vm728_vm3 = vcmp.eq.s32.totalorder %v2425_v4, %v2476_v35  ;;  %v2491_v42 = vrot.slane %v968_v36, %v971_v12  ;;  %p2186_p3 = por %p2185_p13, %p2184_p9 }
  0x6d   : > { %v1855_v43 = vsel %vm728_vm3, 1.0, %v2256_v1  ;;  %vm868_vm4 = vcmp.eq.s32.totalorder %v2425_v4, %v2483_v38  ;;  %v1108_v44 = vadd.s32 %v1106_v39, %v247_v3  ;;  %v1246_v45 = vstv %s2443_s11 }
  0x6e   : > { %v684_v46 = vadd.f32 %v1822_v41, %v544_v40  ;;  %v1888_v47 = vsel %vm868_vm4, 1.0, %v2256_v1  ;;  %vm1008_vm5 = vcmp.eq.s32.totalorder %v2425_v4, %v2491_v42  ;;  %v1248_v48 = vadd.s32 %v1246_v45, %v247_v3  ;;  %p2187_p7 = pnand %p2186_p3, %p2180_p6 }
  0x6f   : > { %v1921_v49 = vsel %vm1008_vm5, 1.0, %v2256_v1  ;;  %v2503_v50 = vrot.slane %v1108_v44, %v1111_v13  ;;  %vm307_vm6 = vcmp.eq.s32.totalorder %v2425_v4, %v2457_v26  ;;  %vm447_vm7 = vcmp.eq.s32.totalorder %v2425_v4, %v2462_v30 }
  0x70   : > { %v824_v51 = vadd.f32 %v1855_v43, %v684_v46  ;;  %v2511_v52 = vrot.slane %v1248_v48, %v1251_v14  ;;  %v1755_v53 = vsel %vm307_vm6, 1.0, %v2256_v1  ;;  %v1788_v54 = vsel %vm447_vm7, 1.0, %v2256_v1 }
  0x71   : > { %vm1148_vm8 = vcmp.eq.s32.totalorder %v2425_v4, %v2503_v50  ;;  %v543_v55 = vadd.f32 %v1788_v54, %v1755_v53  ;;  %v547_v56 = vadd.s32 %v546_v20, %v2430_v6  ;;  %v687_v57 = vadd.s32 %v686_v25, %v2430_v6 }
  0x72   : > { %v964_v58 = vadd.f32 %v1888_v47, %v824_v51  ;;  %v1954_v59 = vsel %vm1148_vm8, 1.0, %v2256_v1  ;;  %vm1288_vm9 = vcmp.eq.s32.totalorder %v2425_v4, %v2511_v52  ;;  %v827_v60 = vadd.s32 %v826_v29, %v2430_v6 }
  0x73   : > { %v1987_v61 = vsel %vm1288_vm9, 1.0, %v2256_v1  ;;  %v2526_v62 = vrot.slane %v547_v56, %v551_v8  ;;  %v2530_v63 = vrot.slane %v687_v57, %v691_v9  ;;  %v967_v3 = vadd.s32 %v966_v33, %v2430_v6 }
  0x74   : > { %v1104_v5 = vadd.f32 %v1921_v49, %v964_v58  ;;  %v2535_v7 = vrot.slane %v827_v60, %v831_v10  ;;  %v1107_v11 = vadd.s32 %v1106_v39, %v2430_v6  ;;  %v1247_v15 = vadd.s32 %v1246_v45, %v2430_v6 }
  0x75   : > { %vm587_vm10 = vcmp.eq.s32.totalorder %v2425_v4, %v2526_v62  ;;  %vm727_vm11 = vcmp.eq.s32.totalorder %v2425_v4, %v2530_v63  ;;  %v2545_v8 = vrot.slane %v967_v3, %v971_v12  ;;  %vm306_vm12 = vcmp.eq.s32.totalorder %v2447_v18, %v2454_v23 }
  0x76   : > { %v1244_v9 = vadd.f32 %v1954_v59, %v1104_v5  ;;  %v1821_v10 = vsel %vm587_vm10, 1.0, %v2256_v1  ;;  %v1854_v16 = vsel %vm727_vm11, 1.0, %v2256_v1  ;;  %vm867_vm13 = vcmp.eq.s32.totalorder %v2425_v4, %v2535_v7 }
  0x77   : > { %v683_v6 = vadd.f32 %v1821_v10, %v543_v55  ;;  %vm1007_vm14 = vcmp.eq.s32.totalorder %v2425_v4, %v2545_v8  ;;  %v2557_v17 = vrot.slane %v1107_v11, %v1111_v13  ;;  %v2560_v12 = vadd.s32 96, %v2418_v2 }
  0x78   : > { %v1384_v19 = vadd.f32 %v1987_v61, %v1244_v9  ;;  %v1887_v20 = vsel %vm867_vm13, 1.0, %v2256_v1  ;;  %v2565_v21 = vrot.slane %v1247_v15, %v1251_v14  ;;  %v1754_v24 = vsel %vm306_vm12, 1.0, %v2256_v1 }
  0x79   : > { %v823_v25 = vadd.f32 %v1854_v16, %v683_v6  ;;  %vm1147_vm15 = vcmp.eq.s32.totalorder %v2425_v4, %v2557_v17  ;;  %vm446_vm0 = vcmp.eq.s32.totalorder %v2447_v18, %v2459_v27  ;;  %vm586_vm1 = vcmp.eq.s32.totalorder %v2447_v18, %v2468_v31 }
  0x7a   : > { %1401 = vmatprep.subr.mxu0 %v1384_v19  ;;  %v1920_v13 = vsel %vm1007_vm14, 1.0, %v2256_v1  ;;  %vm1287_vm2 = vcmp.eq.s32.totalorder %v2425_v4, %v2565_v21  ;;  %v1787_v14 = vsel %vm446_vm0, 1.0, %v2256_v1  ;;  %v1820_v28 = vsel %vm586_vm1, 1.0, %v2256_v1  ;;  %1997 = vmatprep.subr.mxu1 %v1384_v19 }
  0x7b   : > { %v963_v29 = vadd.f32 %v1887_v20, %v823_v25  ;;  %v542_v32 = vadd.f32 %v1787_v14, %v1754_v24  ;;  %vm726_vm3 = vcmp.eq.s32.totalorder %v2447_v18, %v2476_v35  ;;  %v2582_v33 = vadd.s32 88, %v2418_v2 }
  0x7c   : > { %v1953_v34 = vsel %vm1147_vm15, 1.0, %v2256_v1  ;;  %v1853_v36 = vsel %vm726_vm3, 1.0, %v2256_v1  ;;  %vm866_vm4 = vcmp.eq.s32.totalorder %v2447_v18, %v2483_v38  ;;  %vm1006_vm5 = vcmp.eq.s32.totalorder %v2447_v18, %v2491_v42 }
  0x7d   : > { %v1103_v4 = vadd.f32 %v1920_v13, %v963_v29  ;;  %v1986_v37 = vsel %vm1287_vm2, 1.0, %v2256_v1  ;;  %v682_v39 = vadd.f32 %v1820_v28, %v542_v32  ;;  %vm1146_vm6 = vcmp.eq.s32.totalorder %v2447_v18, %v2503_v50 }
  0x7e   : > { %v1886_v40 = vsel %vm866_vm4, 1.0, %v2256_v1  ;;  %v1919_v41 = vsel %vm1006_vm5, 1.0, %v2256_v1  ;;  %vm305_vm7 = vcmp.eq.s32.totalorder %v2447_v18, %v2457_v26  ;;  %vm445_vm8 = vcmp.eq.s32.totalorder %v2447_v18, %v2462_v30 }
  0x7f   : > { %v1243_v43 = vadd.f32 %v1953_v34, %v1103_v4  ;;  %v822_v44 = vadd.f32 %v1853_v36, %v682_v39  ;;  %vm1286_vm9 = vcmp.eq.s32.totalorder %v2447_v18, %v2511_v52  ;;  %v1753_v45 = vsel %vm305_vm7, 1.0, %v2256_v1 }
  0x80   : > { %v1786_v46 = vsel %vm445_vm8, 1.0, %v2256_v1  ;;  %vm585_vm10 = vcmp.eq.s32.totalorder %v2447_v18, %v2526_v62  ;;  %vm725_vm11 = vcmp.eq.s32.totalorder %v2447_v18, %v2530_v63  ;;  %vm865_vm12 = vcmp.eq.s32.totalorder %v2447_v18, %v2535_v7 }
  0x81   : > { %v1383_v47 = vadd.f32 %v1986_v37, %v1243_v43  ;;  %v962_v48 = vadd.f32 %v1886_v40, %v822_v44  ;;  %v541_v49 = vadd.f32 %v1786_v46, %v1753_v45  ;;  %v1819_v51 = vsel %vm585_vm10, 1.0, %v2256_v1 }
  0x82   : > { %v1952_v53 = vsel %vm1146_vm6, 1.0, %v2256_v1  ;;  %v1985_v54 = vsel %vm1286_vm9, 1.0, %v2256_v1  ;;  %v1852_v55 = vsel %vm725_vm11, 1.0, %v2256_v1  ;;  %vm1005_vm13 = vcmp.eq.s32.totalorder %v2447_v18, %v2545_v8 }
  0x83   : > { %1402 = vmatpush1.msra.mxu0 %v1383_v47  ;;  %v1102_v56 = vadd.f32 %v1919_v41, %v962_v48  ;;  %v681_v57 = vadd.f32 %v1819_v51, %v541_v49  ;;  %v1885_v58 = vsel %vm865_vm12, 1.0, %v2256_v1  ;;  %vm1145_vm14 = vcmp.eq.s32.totalorder %v2447_v18, %v2557_v17  ;;  %2013 = vmatpush1.msra.mxu1 %v1383_v47 }
  0x84   : > { %v1918_v59 = vsel %vm1005_vm13, 1.0, %v2256_v1  ;;  %vm304_vm15 = vcmp.eq.s32.totalorder %v2452_v22, %v2454_v23  ;;  %vm444_vm0 = vcmp.eq.s32.totalorder %v2452_v22, %v2459_v27  ;;  %vm584_vm1 = vcmp.eq.s32.totalorder %v2452_v22, %v2468_v31 }
  0x85   : > { %v1242_v60 = vadd.f32 %v1952_v53, %v1102_v56  ;;  %v821_v61 = vadd.f32 %v1852_v55, %v681_v57  ;;  %vm1285_vm2 = vcmp.eq.s32.totalorder %v2447_v18, %v2565_v21  ;;  %v1752_v3 = vsel %vm304_vm15, 1.0, %v2256_v1 }
  0x86   : > { %v1785_v5 = vsel %vm444_vm0, 1.0, %v2256_v1  ;;  %v1818_v11 = vsel %vm584_vm1, 1.0, %v2256_v1  ;;  %vm724_vm3 = vcmp.eq.s32.totalorder %v2452_v22, %v2476_v35  ;;  %vm864_vm4 = vcmp.eq.s32.totalorder %v2452_v22, %v2483_v38 }
  0x87   : > { %v1382_v15 = vadd.f32 %v1985_v54, %v1242_v60  ;;  %v961_v9 = vadd.f32 %v1885_v58, %v821_v61  ;;  %v1951_v10 = vsel %vm1145_vm14, 1.0, %v2256_v1  ;;  %v540_v16 = vadd.f32 %v1785_v5, %v1752_v3 }
  0x88   : > { %v1984_v6 = vsel %vm1285_vm2, 1.0, %v2256_v1  ;;  %v1851_v19 = vsel %vm724_vm3, 1.0, %v2256_v1  ;;  %vm1004_vm5 = vcmp.eq.s32.totalorder %v2452_v22, %v2491_v42  ;;  %vm1144_vm6 = vcmp.eq.s32.totalorder %v2452_v22, %v2503_v50 }
  0x89   : > { %1403 = vmatprep.subr.mxu0 %v1382_v15  ;;  %v1101_v20 = vadd.f32 %v1918_v59, %v961_v9  ;;  %v680_v24 = vadd.f32 %v1818_v11, %v540_v16  ;;  %v1884_v25 = vsel %vm864_vm4, 1.0, %v2256_v1  ;;  %vm1284_vm7 = vcmp.eq.s32.totalorder %v2452_v22, %v2511_v52  ;;  %1998 = vmatprep.subr.mxu1 %v1382_v15 }
  0x8a   : > { %v1917_v18 = vsel %vm1004_vm5, 1.0, %v2256_v1  ;;  %vm303_vm8 = vcmp.eq.s32.totalorder %v2452_v22, %v2457_v26  ;;  %vm443_vm9 = vcmp.eq.s32.totalorder %v2452_v22, %v2462_v30  ;;  %vm583_vm10 = vcmp.eq.s32.totalorder %v2452_v22, %v2526_v62 }
  0x8b   : > { %v1241_v13 = vadd.f32 %v1951_v10, %v1101_v20  ;;  %v820_v14 = vadd.f32 %v1851_v19, %v680_v24  ;;  %v1751_v28 = vsel %vm303_vm8, 1.0, %v2256_v1  ;;  %v1784_v29 = vsel %vm443_vm9, 1.0, %v2256_v1 }
  0x8c   : > { %v539_v32 = vadd.f32 %v1784_v29, %v1751_v28  ;;  %v1817_v34 = vsel %vm583_vm10, 1.0, %v2256_v1  ;;  %vm723_vm11 = vcmp.eq.s32.totalorder %v2452_v22, %v2530_v63  ;;  %vm863_vm12 = vcmp.eq.s32.totalorder %v2452_v22, %v2535_v7 }
  0x8d   : > { %v1381_v36 = vadd.f32 %v1984_v6, %v1241_v13  ;;  %v960_v4 = vadd.f32 %v1884_v25, %v820_v14  ;;  %v1950_v37 = vsel %vm1144_vm6, 1.0, %v2256_v1  ;;  %v1850_v39 = vsel %vm723_vm11, 1.0, %v2256_v1 }
  0x8e   : > { %v1983_v40 = vsel %vm1284_vm7, 1.0, %v2256_v1  ;;  %v679_v41 = vadd.f32 %v1817_v34, %v539_v32  ;;  %v1883_v43 = vsel %vm863_vm12, 1.0, %v2256_v1  ;;  %vm1003_vm13 = vcmp.eq.s32.totalorder %v2452_v22, %v2545_v8 }
  0x8f   : > { %1404 = vmatpush1.msra.mxu0 %v1381_v36  ;;  %v1100_v44 = vadd.f32 %v1917_v18, %v960_v4  ;;  %v1916_v45 = vsel %vm1003_vm13, 1.0, %v2256_v1  ;;  %vm1143_vm14 = vcmp.eq.s32.totalorder %v2452_v22, %v2557_v17  ;;  %vm1283_vm15 = vcmp.eq.s32.totalorder %v2452_v22, %v2565_v21  ;;  %2014 = vmatpush1.msra.mxu1 %v1381_v36 }
  0x90   : > { %v819_v46 = vadd.f32 %v1850_v39, %v679_v41  ;;  %vm302_vm0 = vcmp.eq.s32.totalorder %v2560_v12, %v2454_v23  ;;  %vm442_vm1 = vcmp.eq.s32.totalorder %v2560_v12, %v2459_v27  ;;  %vm582_vm2 = vcmp.eq.s32.totalorder %v2560_v12, %v2468_v31 }
  0x91   : > { %v1240_v47 = vadd.f32 %v1950_v37, %v1100_v44  ;;  %v1750_v48 = vsel %vm302_vm0, 1.0, %v2256_v1  ;;  %v1783_v49 = vsel %vm442_vm1, 1.0, %v2256_v1  ;;  %v1816_v51 = vsel %vm582_vm2, 1.0, %v2256_v1 }
  0x92   : > { %v959_v53 = vadd.f32 %v1883_v43, %v819_v46  ;;  %v538_v54 = vadd.f32 %v1783_v49, %v1750_v48  ;;  %vm722_vm3 = vcmp.eq.s32.totalorder %v2560_v12, %v2476_v35  ;;  %vm862_vm4 = vcmp.eq.s32.totalorder %v2560_v12, %v2483_v38 }
  0x93   : > { %v1380_v55 = vadd.f32 %v1983_v40, %v1240_v47  ;;  %v1949_v56 = vsel %vm1143_vm14, 1.0, %v2256_v1  ;;  %v1849_v57 = vsel %vm722_vm3, 1.0, %v2256_v1  ;;  %vm1002_vm5 = vcmp.eq.s32.totalorder %v2560_v12, %v2491_v42 }
  0x94   : > { %v1099_v58 = vadd.f32 %v1916_v45, %v959_v53  ;;  %v1982_v59 = vsel %vm1283_vm15, 1.0, %v2256_v1  ;;  %v678_v60 = vadd.f32 %v1816_v51, %v538_v54  ;;  %v1882_v61 = vsel %vm862_vm4, 1.0, %v2256_v1 }
  0x95   : > { %1405 = vmatprep.subr.mxu0 %v1380_v55  ;;  %v1915_v3 = vsel %vm1002_vm5, 1.0, %v2256_v1  ;;  %vm1142_vm6 = vcmp.eq.s32.totalorder %v2560_v12, %v2503_v50  ;;  %vm301_vm7 = vcmp.eq.s32.totalorder %v2560_v12, %v2457_v26  ;;  %vm441_vm8 = vcmp.eq.s32.totalorder %v2560_v12, %v2462_v30  ;;  %1999 = vmatprep.subr.mxu1 %v1380_v55 }
  0x96   : > { %v1239_v5 = vadd.f32 %v1949_v56, %v1099_v58  ;;  %v818_v11 = vadd.f32 %v1849_v57, %v678_v60  ;;  %vm1282_vm9 = vcmp.eq.s32.totalorder %v2560_v12, %v2511_v52  ;;  %v1749_v22 = vsel %vm301_vm7, 1.0, %v2256_v1 }
  0x97   : > { %v1782_v15 = vsel %vm441_vm8, 1.0, %v2256_v1  ;;  %vm581_vm10 = vcmp.eq.s32.totalorder %v2560_v12, %v2526_v62  ;;  %vm721_vm11 = vcmp.eq.s32.totalorder %v2560_v12, %v2530_v63  ;;  %vm861_vm12 = vcmp.eq.s32.totalorder %v2560_v12, %v2535_v7 }
  0x98   : > { %v1379_v9 = vadd.f32 %v1982_v59, %v1239_v5  ;;  %v958_v10 = vadd.f32 %v1882_v61, %v818_v11  ;;  %v537_v16 = vadd.f32 %v1782_v15, %v1749_v22  ;;  %v1815_v6 = vsel %vm581_vm10, 1.0, %v2256_v1 }
  0x99   : > { %v1948_v19 = vsel %vm1142_vm6, 1.0, %v2256_v1  ;;  %v1981_v20 = vsel %vm1282_vm9, 1.0, %v2256_v1  ;;  %v1848_v24 = vsel %vm721_vm11, 1.0, %v2256_v1  ;;  %vm1001_vm13 = vcmp.eq.s32.totalorder %v2560_v12, %v2545_v8 }
  0x9a   : > { %1406 = vmatpush1.msra.mxu0 %v1379_v9  ;;  %v1098_v25 = vadd.f32 %v1915_v3, %v958_v10  ;;  %v677_v18 = vadd.f32 %v1815_v6, %v537_v16  ;;  %v1881_v13 = vsel %vm861_vm12, 1.0, %v2256_v1  ;;  %vm1141_vm14 = vcmp.eq.s32.totalorder %v2560_v12, %v2557_v17  ;;  %2015 = vmatpush1.msra.mxu1 %v1379_v9 }
  0x9b   : > { %v1914_v14 = vsel %vm1001_vm13, 1.0, %v2256_v1  ;;  %vm300_vm15 = vcmp.eq.s32.totalorder %v2582_v33, %v2454_v23  ;;  %vm440_vm0 = vcmp.eq.s32.totalorder %v2582_v33, %v2459_v27  ;;  %vm580_vm1 = vcmp.eq.s32.totalorder %v2582_v33, %v2468_v31 }
  0x9c   : > { %v1238_v28 = vadd.f32 %v1948_v19, %v1098_v25  ;;  %v817_v29 = vadd.f32 %v1848_v24, %v677_v18  ;;  %vm1281_vm2 = vcmp.eq.s32.totalorder %v2560_v12, %v2565_v21  ;;  %v1748_v32 = vsel %vm300_vm15, 1.0, %v2256_v1 }
  0x9d   : > { %v1781_v34 = vsel %vm440_vm0, 1.0, %v2256_v1  ;;  %v1814_v36 = vsel %vm580_vm1, 1.0, %v2256_v1  ;;  %vm720_vm3 = vcmp.eq.s32.totalorder %v2582_v33, %v2476_v35  ;;  %vm860_vm4 = vcmp.eq.s32.totalorder %v2582_v33, %v2483_v38 }
  0x9e   : > { %v1378_v4 = vadd.f32 %v1981_v20, %v1238_v28  ;;  %v957_v37 = vadd.f32 %v1881_v13, %v817_v29  ;;  %v1947_v39 = vsel %vm1141_vm14, 1.0, %v2256_v1  ;;  %v536_v40 = vadd.f32 %v1781_v34, %v1748_v32 }
  0x9f   : > { %v1980_v41 = vsel %vm1281_vm2, 1.0, %v2256_v1  ;;  %v1847_v43 = vsel %vm720_vm3, 1.0, %v2256_v1  ;;  %vm1000_vm5 = vcmp.eq.s32.totalorder %v2582_v33, %v2491_v42  ;;  %vm1140_vm6 = vcmp.eq.s32.totalorder %v2582_v33, %v2503_v50 }
  0xa0   : > { %1407 = vmatprep.subr.mxu0 %v1378_v4  ;;  %v1097_v44 = vadd.f32 %v1914_v14, %v957_v37  ;;  %v676_v45 = vadd.f32 %v1814_v36, %v536_v40  ;;  %v1880_v46 = vsel %vm860_vm4, 1.0, %v2256_v1  ;;  %vm1280_vm7 = vcmp.eq.s32.totalorder %v2582_v33, %v2511_v52  ;;  %2000 = vmatprep.subr.mxu1 %v1378_v4 }
  0xa1   : > { %v1913_v12 = vsel %vm1000_vm5, 1.0, %v2256_v1  ;;  %vm299_vm8 = vcmp.eq.s32.totalorder %v2582_v33, %v2457_v26  ;;  %vm439_vm9 = vcmp.eq.s32.totalorder %v2582_v33, %v2462_v30  ;;  %vm579_vm10 = vcmp.eq.s32.totalorder %v2582_v33, %v2526_v62 }
  0xa2   : > { %v1237_v47 = vadd.f32 %v1947_v39, %v1097_v44  ;;  %v816_v48 = vadd.f32 %v1847_v43, %v676_v45  ;;  %v1747_v49 = vsel %vm299_vm8, 1.0, %v2256_v1  ;;  %v1780_v51 = vsel %vm439_vm9, 1.0, %v2256_v1 }
  0xa3   : > { %v535_v53 = vadd.f32 %v1780_v51, %v1747_v49  ;;  %v1813_v54 = vsel %vm579_vm10, 1.0, %v2256_v1  ;;  %vm719_vm11 = vcmp.eq.s32.totalorder %v2582_v33, %v2530_v63  ;;  %vm859_vm12 = vcmp.eq.s32.totalorder %v2582_v33, %v2535_v7 }
  0xa4   : > { %v1377_v55 = vadd.f32 %v1980_v41, %v1237_v47  ;;  %v956_v56 = vadd.f32 %v1880_v46, %v816_v48  ;;  %v1946_v57 = vsel %vm1140_vm6, 1.0, %v2256_v1  ;;  %v1846_v58 = vsel %vm719_vm11, 1.0, %v2256_v1 }
  0xa5   : > { %v675_v59 = vadd.f32 %v1813_v54, %v535_v53  ;;  %vm999_vm13 = vcmp.eq.s32.totalorder %v2582_v33, %v2545_v8  ;;  %vm1139_vm14 = vcmp.eq.s32.totalorder %v2582_v33, %v2557_v17  ;;  %vm1279_vm15 = vcmp.eq.s32.totalorder %v2582_v33, %v2565_v21 }
  0xa6   : > { %1408 = vmatpush1.msra.mxu0 %v1377_v55  ;;  %v1096_v60 = vadd.f32 %v1913_v12, %v956_v56  ;;  %v1979_v61 = vsel %vm1280_vm7, 1.0, %v2256_v1  ;;  %v1879_v3 = vsel %vm859_vm12, 1.0, %v2256_v1  ;;  %v1912_v5 = vsel %vm999_vm13, 1.0, %v2256_v1  ;;  %2016 = vmatpush1.msra.mxu1 %v1377_v55 }
  0xa7   : > { %v815_v11 = vadd.f32 %v1846_v58, %v675_v59  ;;  %v1945_v22 = vsel %vm1139_vm14, 1.0, %v2256_v1  ;;  %v1978_v15 = vsel %vm1279_vm15, 1.0, %v2256_v1  ;;  %v2798_v9 = vadd.s32 80, %v2418_v2 }
  0xa8   : > { %v1236_v10 = vadd.f32 %v1946_v57, %v1096_v60  ;;  %v2801_v16 = vadd.s32 72, %v2418_v2  ;;  %v2804_v33 = vadd.s32 64, %v2418_v2  ;;  %v2807_v6 = vadd.s32 56, %v2418_v2 }
  0xa9   : > { %v955_v19 = vadd.f32 %v1879_v3, %v815_v11  ;;  %vm298_vm0 = vcmp.eq.s32.totalorder %v2798_v9, %v2454_v23  ;;  %vm438_vm1 = vcmp.eq.s32.totalorder %v2798_v9, %v2459_v27  ;;  %vm578_vm2 = vcmp.eq.s32.totalorder %v2798_v9, %v2468_v31 }
  0xaa   : > { %v1376_v20 = vadd.f32 %v1979_v61, %v1236_v10  ;;  %v1746_v24 = vsel %vm298_vm0, 1.0, %v2256_v1  ;;  %v1779_v25 = vsel %vm438_vm1, 1.0, %v2256_v1  ;;  %v1812_v18 = vsel %vm578_vm2, 1.0, %v2256_v1 }
  0xab   : > { %v1095_v13 = vadd.f32 %v1912_v5, %v955_v19  ;;  %v534_v14 = vadd.f32 %v1779_v25, %v1746_v24  ;;  %vm718_vm3 = vcmp.eq.s32.totalorder %v2798_v9, %v2476_v35  ;;  %vm858_vm4 = vcmp.eq.s32.totalorder %v2798_v9, %v2483_v38 }
  0xac   : > { %1409 = vmatprep.subr.mxu0 %v1376_v20  ;;  %v1845_v28 = vsel %vm718_vm3, 1.0, %v2256_v1  ;;  %vm998_vm5 = vcmp.eq.s32.totalorder %v2798_v9, %v2491_v42  ;;  %v2826_v29 = vadd.s32 48, %v2418_v2  ;;  %v2829_v32 = vadd.s32 40, %v2418_v2  ;;  %2001 = vmatprep.subr.mxu1 %v1376_v20 }
  0xad   : > { %v1235_v34 = vadd.f32 %v1945_v22, %v1095_v13  ;;  %v674_v36 = vadd.f32 %v1812_v18, %v534_v14  ;;  %v1878_v4 = vsel %vm858_vm4, 1.0, %v2256_v1  ;;  %vm1138_vm6 = vcmp.eq.s32.totalorder %v2798_v9, %v2503_v50 }
  0xae   : > { %vm1278_vm7 = vcmp.eq.s32.totalorder %v2798_v9, %v2511_v52  ;;  %vm297_vm8 = vcmp.eq.s32.totalorder %v2798_v9, %v2457_v26  ;;  %vm437_vm9 = vcmp.eq.s32.totalorder %v2798_v9, %v2462_v30  ;;  %vm577_vm10 = vcmp.eq.s32.totalorder %v2798_v9, %v2526_v62 }
  0xaf   : > { %v1375_v37 = vadd.f32 %v1978_v15, %v1235_v34  ;;  %v814_v39 = vadd.f32 %v1845_v28, %v674_v36  ;;  %v1911_v40 = vsel %vm998_vm5, 1.0, %v2256_v1  ;;  %v1745_v41 = vsel %vm297_vm8, 1.0, %v2256_v1 }
  0xb0   : > { %v1778_v43 = vsel %vm437_vm9, 1.0, %v2256_v1  ;;  %v1811_v44 = vsel %vm577_vm10, 1.0, %v2256_v1  ;;  %vm717_vm11 = vcmp.eq.s32.totalorder %v2798_v9, %v2530_v63  ;;  %vm857_vm12 = vcmp.eq.s32.totalorder %v2798_v9, %v2535_v7 }
  0xb1   : > { %1410 = vmatpush1.msra.mxu0 %v1375_v37  ;;  %v954_v45 = vadd.f32 %v1878_v4, %v814_v39  ;;  %v1944_v46 = vsel %vm1138_vm6, 1.0, %v2256_v1  ;;  %v1977_v12 = vsel %vm1278_vm7, 1.0, %v2256_v1  ;;  %v533_v47 = vadd.f32 %v1778_v43, %v1745_v41  ;;  %2017 = vmatpush1.msra.mxu1 %v1375_v37 }
  0xb2   : > { %v1844_v48 = vsel %vm717_vm11, 1.0, %v2256_v1  ;;  %v1877_v49 = vsel %vm857_vm12, 1.0, %v2256_v1  ;;  %vm997_vm13 = vcmp.eq.s32.totalorder %v2798_v9, %v2545_v8  ;;  %vm296_vm14 = vcmp.eq.s32.totalorder %v2801_v16, %v2454_v23 }
  0xb3   : > { %v1094_v51 = vadd.f32 %v1911_v40, %v954_v45  ;;  %v673_v53 = vadd.f32 %v1811_v44, %v533_v47  ;;  %vm1137_vm15 = vcmp.eq.s32.totalorder %v2798_v9, %v2557_v17  ;;  %vm1277_vm0 = vcmp.eq.s32.totalorder %v2798_v9, %v2565_v21 }
  0xb4   : > { %v1910_v54 = vsel %vm997_vm13, 1.0, %v2256_v1  ;;  %v1744_v55 = vsel %vm296_vm14, 1.0, %v2256_v1  ;;  %vm436_vm1 = vcmp.eq.s32.totalorder %v2801_v16, %v2459_v27  ;;  %vm576_vm2 = vcmp.eq.s32.totalorder %v2801_v16, %v2468_v31 }
  0xb5   : > { %v1234_v56 = vadd.f32 %v1944_v46, %v1094_v51  ;;  %v813_v57 = vadd.f32 %v1844_v48, %v673_v53  ;;  %v1777_v58 = vsel %vm436_vm1, 1.0, %v2256_v1  ;;  %v1810_v59 = vsel %vm576_vm2, 1.0, %v2256_v1 }
  0xb6   : > { %v532_v60 = vadd.f32 %v1777_v58, %v1744_v55  ;;  %vm716_vm3 = vcmp.eq.s32.totalorder %v2801_v16, %v2476_v35  ;;  %vm856_vm4 = vcmp.eq.s32.totalorder %v2801_v16, %v2483_v38  ;;  %vm996_vm5 = vcmp.eq.s32.totalorder %v2801_v16, %v2491_v42 }
  0xb7   : > { %v1374_v61 = vadd.f32 %v1977_v12, %v1234_v56  ;;  %v953_v3 = vadd.f32 %v1877_v49, %v813_v57  ;;  %v1943_v5 = vsel %vm1137_vm15, 1.0, %v2256_v1  ;;  %v1843_v11 = vsel %vm716_vm3, 1.0, %v2256_v1 }
  0xb8   : > { %v1976_v22 = vsel %vm1277_vm0, 1.0, %v2256_v1  ;;  %v672_v15 = vadd.f32 %v1810_v59, %v532_v60  ;;  %v1876_v10 = vsel %vm856_vm4, 1.0, %v2256_v1  ;;  %vm1136_vm6 = vcmp.eq.s32.totalorder %v2801_v16, %v2503_v50 }
  0xb9   : > { %1411 = vmatprep.subr.mxu0 %v1374_v61  ;;  %v1093_v19 = vadd.f32 %v1910_v54, %v953_v3  ;;  %v1909_v20 = vsel %vm996_vm5, 1.0, %v2256_v1  ;;  %vm1276_vm7 = vcmp.eq.s32.totalorder %v2801_v16, %v2511_v52  ;;  %vm295_vm8 = vcmp.eq.s32.totalorder %v2801_v16, %v2457_v26  ;;  %2002 = vmatprep.subr.mxu1 %v1374_v61 }
  0xba   : > { %v812_v24 = vadd.f32 %v1843_v11, %v672_v15  ;;  %v1743_v9 = vsel %vm295_vm8, 1.0, %v2256_v1  ;;  %vm435_vm9 = vcmp.eq.s32.totalorder %v2801_v16, %v2462_v30  ;;  %vm575_vm10 = vcmp.eq.s32.totalorder %v2801_v16, %v2526_v62 }
  0xbb   : > { %v1233_v25 = vadd.f32 %v1943_v5, %v1093_v19  ;;  %v1776_v18 = vsel %vm435_vm9, 1.0, %v2256_v1  ;;  %v1809_v13 = vsel %vm575_vm10, 1.0, %v2256_v1  ;;  %vm715_vm11 = vcmp.eq.s32.totalorder %v2801_v16, %v2530_v63 }
  0xbc   : > { %v952_v14 = vadd.f32 %v1876_v10, %v812_v24  ;;  %v1942_v28 = vsel %vm1136_vm6, 1.0, %v2256_v1  ;;  %v531_v34 = vadd.f32 %v1776_v18, %v1743_v9  ;;  %vm855_vm12 = vcmp.eq.s32.totalorder %v2801_v16, %v2535_v7 }
  0xbd   : > { %v1373_v36 = vadd.f32 %v1976_v22, %v1233_v25  ;;  %v1975_v4 = vsel %vm1276_vm7, 1.0, %v2256_v1  ;;  %v1842_v37 = vsel %vm715_vm11, 1.0, %v2256_v1  ;;  %vm995_vm13 = vcmp.eq.s32.totalorder %v2801_v16, %v2545_v8 }
  0xbe   : > { %v1092_v39 = vadd.f32 %v1909_v20, %v952_v14  ;;  %v671_v40 = vadd.f32 %v1809_v13, %v531_v34  ;;  %v1875_v41 = vsel %vm855_vm12, 1.0, %v2256_v1  ;;  %vm1135_vm14 = vcmp.eq.s32.totalorder %v2801_v16, %v2557_v17 }
  0xbf   : > { %1412 = vmatpush1.msra.mxu0 %v1373_v36  ;;  %v1908_v43 = vsel %vm995_vm13, 1.0, %v2256_v1  ;;  %vm294_vm15 = vcmp.eq.s32.totalorder %v2804_v33, %v2454_v23  ;;  %vm434_vm0 = vcmp.eq.s32.totalorder %v2804_v33, %v2459_v27  ;;  %vm574_vm1 = vcmp.eq.s32.totalorder %v2804_v33, %v2468_v31  ;;  %2018 = vmatpush1.msra.mxu1 %v1373_v36 }
  0xc0   : > { %v1232_v44 = vadd.f32 %v1942_v28, %v1092_v39  ;;  %v811_v45 = vadd.f32 %v1842_v37, %v671_v40  ;;  %vm1275_vm2 = vcmp.eq.s32.totalorder %v2801_v16, %v2565_v21  ;;  %v1742_v46 = vsel %vm294_vm15, 1.0, %v2256_v1 }
  0xc1   : > { %v1775_v12 = vsel %vm434_vm0, 1.0, %v2256_v1  ;;  %v1808_v47 = vsel %vm574_vm1, 1.0, %v2256_v1  ;;  %vm714_vm3 = vcmp.eq.s32.totalorder %v2804_v33, %v2476_v35  ;;  %vm854_vm4 = vcmp.eq.s32.totalorder %v2804_v33, %v2483_v38 }
  0xc2   : > { %v1372_v48 = vadd.f32 %v1975_v4, %v1232_v44  ;;  %v951_v49 = vadd.f32 %v1875_v41, %v811_v45  ;;  %v1941_v51 = vsel %vm1135_vm14, 1.0, %v2256_v1  ;;  %v530_v53 = vadd.f32 %v1775_v12, %v1742_v46 }
  0xc3   : > { %v1974_v54 = vsel %vm1275_vm2, 1.0, %v2256_v1  ;;  %v1841_v55 = vsel %vm714_vm3, 1.0, %v2256_v1  ;;  %vm994_vm5 = vcmp.eq.s32.totalorder %v2804_v33, %v2491_v42  ;;  %vm1134_vm6 = vcmp.eq.s32.totalorder %v2804_v33, %v2503_v50 }
  0xc4   : > { %1413 = vmatprep.subr.mxu0 %v1372_v48  ;;  %v1091_v56 = vadd.f32 %v1908_v43, %v951_v49  ;;  %v670_v57 = vadd.f32 %v1808_v47, %v530_v53  ;;  %v1874_v58 = vsel %vm854_vm4, 1.0, %v2256_v1  ;;  %vm1274_vm7 = vcmp.eq.s32.totalorder %v2804_v33, %v2511_v52  ;;  %2003 = vmatprep.subr.mxu1 %v1372_v48 }
  0xc5   : > { %v1907_v16 = vsel %vm994_vm5, 1.0, %v2256_v1  ;;  %vm293_vm8 = vcmp.eq.s32.totalorder %v2804_v33, %v2457_v26  ;;  %vm433_vm9 = vcmp.eq.s32.totalorder %v2804_v33, %v2462_v30  ;;  %vm573_vm10 = vcmp.eq.s32.totalorder %v2804_v33, %v2526_v62 }
  0xc6   : > { %v1231_v59 = vadd.f32 %v1941_v51, %v1091_v56  ;;  %v810_v60 = vadd.f32 %v1841_v55, %v670_v57  ;;  %v1741_v61 = vsel %vm293_vm8, 1.0, %v2256_v1  ;;  %v1774_v3 = vsel %vm433_vm9, 1.0, %v2256_v1 }
  0xc7   : > { %v529_v5 = vadd.f32 %v1774_v3, %v1741_v61  ;;  %v1807_v11 = vsel %vm573_vm10, 1.0, %v2256_v1  ;;  %vm713_vm11 = vcmp.eq.s32.totalorder %v2804_v33, %v2530_v63  ;;  %vm853_vm12 = vcmp.eq.s32.totalorder %v2804_v33, %v2535_v7 }
  0xc8   : > { %v1371_v22 = vadd.f32 %v1974_v54, %v1231_v59  ;;  %v950_v15 = vadd.f32 %v1874_v58, %v810_v60  ;;  %v1940_v10 = vsel %vm1134_vm6, 1.0, %v2256_v1  ;;  %v1840_v19 = vsel %vm713_vm11, 1.0, %v2256_v1 }
  0xc9   : > { %v1973_v20 = vsel %vm1274_vm7, 1.0, %v2256_v1  ;;  %v669_v24 = vadd.f32 %v1807_v11, %v529_v5  ;;  %v1873_v9 = vsel %vm853_vm12, 1.0, %v2256_v1  ;;  %vm993_vm13 = vcmp.eq.s32.totalorder %v2804_v33, %v2545_v8 }
  0xca   : > { %1414 = vmatpush1.msra.mxu0 %v1371_v22  ;;  %v1090_v25 = vadd.f32 %v1907_v16, %v950_v15  ;;  %v1906_v18 = vsel %vm993_vm13, 1.0, %v2256_v1  ;;  %vm1133_vm14 = vcmp.eq.s32.totalorder %v2804_v33, %v2557_v17  ;;  %vm1273_vm15 = vcmp.eq.s32.totalorder %v2804_v33, %v2565_v21  ;;  %2019 = vmatpush1.msra.mxu1 %v1371_v22 }
  0xcb   : > { %v809_v13 = vadd.f32 %v1840_v19, %v669_v24  ;;  %vm292_vm0 = vcmp.eq.s32.totalorder %v2807_v6, %v2454_v23  ;;  %vm432_vm1 = vcmp.eq.s32.totalorder %v2807_v6, %v2459_v27  ;;  %vm572_vm2 = vcmp.eq.s32.totalorder %v2807_v6, %v2468_v31 }
  0xcc   : > { %v1230_v14 = vadd.f32 %v1940_v10, %v1090_v25  ;;  %v1740_v28 = vsel %vm292_vm0, 1.0, %v2256_v1  ;;  %v1773_v34 = vsel %vm432_vm1, 1.0, %v2256_v1  ;;  %v1806_v36 = vsel %vm572_vm2, 1.0, %v2256_v1 }
  0xcd   : > { %v949_v4 = vadd.f32 %v1873_v9, %v809_v13  ;;  %v528_v37 = vadd.f32 %v1773_v34, %v1740_v28  ;;  %vm712_vm3 = vcmp.eq.s32.totalorder %v2807_v6, %v2476_v35  ;;  %vm852_vm4 = vcmp.eq.s32.totalorder %v2807_v6, %v2483_v38 }
  0xce   : > { %v1370_v39 = vadd.f32 %v1973_v20, %v1230_v14  ;;  %v1939_v40 = vsel %vm1133_vm14, 1.0, %v2256_v1  ;;  %v1839_v41 = vsel %vm712_vm3, 1.0, %v2256_v1  ;;  %vm992_vm5 = vcmp.eq.s32.totalorder %v2807_v6, %v2491_v42 }
  0xcf   : > { %v1089_v43 = vadd.f32 %v1906_v18, %v949_v4  ;;  %v1972_v44 = vsel %vm1273_vm15, 1.0, %v2256_v1  ;;  %v668_v45 = vadd.f32 %v1806_v36, %v528_v37  ;;  %v1872_v46 = vsel %vm852_vm4, 1.0, %v2256_v1 }
  0xd0   : > { %1415 = vmatprep.subr.mxu0 %v1370_v39  ;;  %v1905_v12 = vsel %vm992_vm5, 1.0, %v2256_v1  ;;  %vm1132_vm6 = vcmp.eq.s32.totalorder %v2807_v6, %v2503_v50  ;;  %vm291_vm7 = vcmp.eq.s32.totalorder %v2807_v6, %v2457_v26  ;;  %vm431_vm8 = vcmp.eq.s32.totalorder %v2807_v6, %v2462_v30  ;;  %2004 = vmatprep.subr.mxu1 %v1370_v39 }
  0xd1   : > { %v1229_v47 = vadd.f32 %v1939_v40, %v1089_v43  ;;  %v808_v48 = vadd.f32 %v1839_v41, %v668_v45  ;;  %vm1272_vm9 = vcmp.eq.s32.totalorder %v2807_v6, %v2511_v52  ;;  %v1739_v33 = vsel %vm291_vm7, 1.0, %v2256_v1 }
  0xd2   : > { %v1772_v49 = vsel %vm431_vm8, 1.0, %v2256_v1  ;;  %vm571_vm10 = vcmp.eq.s32.totalorder %v2807_v6, %v2526_v62  ;;  %vm711_vm11 = vcmp.eq.s32.totalorder %v2807_v6, %v2530_v63  ;;  %vm851_vm12 = vcmp.eq.s32.totalorder %v2807_v6, %v2535_v7 }
  0xd3   : > { %v1369_v51 = vadd.f32 %v1972_v44, %v1229_v47  ;;  %v948_v53 = vadd.f32 %v1872_v46, %v808_v48  ;;  %v527_v54 = vadd.f32 %v1772_v49, %v1739_v33  ;;  %v1805_v55 = vsel %vm571_vm10, 1.0, %v2256_v1 }
  0xd4   : > { %v1938_v56 = vsel %vm1132_vm6, 1.0, %v2256_v1  ;;  %v1971_v57 = vsel %vm1272_vm9, 1.0, %v2256_v1  ;;  %v1838_v58 = vsel %vm711_vm11, 1.0, %v2256_v1  ;;  %vm991_vm13 = vcmp.eq.s32.totalorder %v2807_v6, %v2545_v8 }
  0xd5   : > { %1416 = vmatpush1.msra.mxu0 %v1369_v51  ;;  %v1088_v16 = vadd.f32 %v1905_v12, %v948_v53  ;;  %v667_v59 = vadd.f32 %v1805_v55, %v527_v54  ;;  %v1871_v60 = vsel %vm851_vm12, 1.0, %v2256_v1  ;;  %vm1131_vm14 = vcmp.eq.s32.totalorder %v2807_v6, %v2557_v17  ;;  %2020 = vmatpush1.msra.mxu1 %v1369_v51 }
  0xd6   : > { %v1904_v61 = vsel %vm991_vm13, 1.0, %v2256_v1  ;;  %vm290_vm15 = vcmp.eq.s32.totalorder %v2826_v29, %v2454_v23  ;;  %vm430_vm0 = vcmp.eq.s32.totalorder %v2826_v29, %v2459_v27  ;;  %vm570_vm1 = vcmp.eq.s32.totalorder %v2826_v29, %v2468_v31 }
  0xd7   : > { %v1228_v3 = vadd.f32 %v1938_v56, %v1088_v16  ;;  %v807_v5 = vadd.f32 %v1838_v58, %v667_v59  ;;  %vm1271_vm2 = vcmp.eq.s32.totalorder %v2807_v6, %v2565_v21  ;;  %v1738_v11 = vsel %vm290_vm15, 1.0, %v2256_v1 }
  0xd8   : > { %v1771_v22 = vsel %vm430_vm0, 1.0, %v2256_v1  ;;  %v1804_v15 = vsel %vm570_vm1, 1.0, %v2256_v1  ;;  %vm710_vm3 = vcmp.eq.s32.totalorder %v2826_v29, %v2476_v35  ;;  %vm850_vm4 = vcmp.eq.s32.totalorder %v2826_v29, %v2483_v38 }
  0xd9   : > { %v1368_v10 = vadd.f32 %v1971_v57, %v1228_v3  ;;  %v947_v19 = vadd.f32 %v1871_v60, %v807_v5  ;;  %v1937_v20 = vsel %vm1131_vm14, 1.0, %v2256_v1  ;;  %v526_v24 = vadd.f32 %v1771_v22, %v1738_v11 }
  0xda   : > { %v1970_v9 = vsel %vm1271_vm2, 1.0, %v2256_v1  ;;  %v1837_v25 = vsel %vm710_vm3, 1.0, %v2256_v1  ;;  %vm990_vm5 = vcmp.eq.s32.totalorder %v2826_v29, %v2491_v42  ;;  %vm1130_vm6 = vcmp.eq.s32.totalorder %v2826_v29, %v2503_v50 }
  0xdb   : > { %1417 = vmatprep.subr.mxu0 %v1368_v10  ;;  %v1087_v18 = vadd.f32 %v1904_v61, %v947_v19  ;;  %v666_v13 = vadd.f32 %v1804_v15, %v526_v24  ;;  %v1870_v14 = vsel %vm850_vm4, 1.0, %v2256_v1  ;;  %vm1270_vm7 = vcmp.eq.s32.totalorder %v2826_v29, %v2511_v52  ;;  %2005 = vmatprep.subr.mxu1 %v1368_v10 }
  0xdc   : > { %v1903_v6 = vsel %vm990_vm5, 1.0, %v2256_v1  ;;  %vm289_vm8 = vcmp.eq.s32.totalorder %v2826_v29, %v2457_v26  ;;  %vm429_vm9 = vcmp.eq.s32.totalorder %v2826_v29, %v2462_v30  ;;  %vm569_vm10 = vcmp.eq.s32.totalorder %v2826_v29, %v2526_v62 }
  0xdd   : > { %v1227_v28 = vadd.f32 %v1937_v20, %v1087_v18  ;;  %v806_v34 = vadd.f32 %v1837_v25, %v666_v13  ;;  %v1737_v36 = vsel %vm289_vm8, 1.0, %v2256_v1  ;;  %v1770_v4 = vsel %vm429_vm9, 1.0, %v2256_v1 }
  0xde   : > { %v525_v37 = vadd.f32 %v1770_v4, %v1737_v36  ;;  %v1803_v39 = vsel %vm569_vm10, 1.0, %v2256_v1  ;;  %vm709_vm11 = vcmp.eq.s32.totalorder %v2826_v29, %v2530_v63  ;;  %vm849_vm12 = vcmp.eq.s32.totalorder %v2826_v29, %v2535_v7 }
  0xdf   : > { %v1367_v40 = vadd.f32 %v1970_v9, %v1227_v28  ;;  %v946_v41 = vadd.f32 %v1870_v14, %v806_v34  ;;  %v1936_v43 = vsel %vm1130_vm6, 1.0, %v2256_v1  ;;  %v1836_v44 = vsel %vm709_vm11, 1.0, %v2256_v1 }
  0xe0   : > { %v1969_v45 = vsel %vm1270_vm7, 1.0, %v2256_v1  ;;  %v665_v46 = vadd.f32 %v1803_v39, %v525_v37  ;;  %v1869_v12 = vsel %vm849_vm12, 1.0, %v2256_v1  ;;  %vm989_vm13 = vcmp.eq.s32.totalorder %v2826_v29, %v2545_v8 }
  0xe1   : > { %1418 = vmatpush1.msra.mxu0 %v1367_v40  ;;  %v1086_v47 = vadd.f32 %v1903_v6, %v946_v41  ;;  %v1902_v48 = vsel %vm989_vm13, 1.0, %v2256_v1  ;;  %vm1129_vm14 = vcmp.eq.s32.totalorder %v2826_v29, %v2557_v17  ;;  %vm1269_vm15 = vcmp.eq.s32.totalorder %v2826_v29, %v2565_v21  ;;  %2021 = vmatpush1.msra.mxu1 %v1367_v40 }
  0xe2   : > { %v805_v33 = vadd.f32 %v1836_v44, %v665_v46  ;;  %vm288_vm0 = vcmp.eq.s32.totalorder %v2829_v32, %v2454_v23  ;;  %vm428_vm1 = vcmp.eq.s32.totalorder %v2829_v32, %v2459_v27  ;;  %vm568_vm2 = vcmp.eq.s32.totalorder %v2829_v32, %v2468_v31 }
  0xe3   : > { %v1226_v49 = vadd.f32 %v1936_v43, %v1086_v47  ;;  %v1736_v51 = vsel %vm288_vm0, 1.0, %v2256_v1  ;;  %v1769_v53 = vsel %vm428_vm1, 1.0, %v2256_v1  ;;  %v1802_v54 = vsel %vm568_vm2, 1.0, %v2256_v1 }
  0xe4   : > { %v945_v55 = vadd.f32 %v1869_v12, %v805_v33  ;;  %v524_v56 = vadd.f32 %v1769_v53, %v1736_v51  ;;  %vm708_vm3 = vcmp.eq.s32.totalorder %v2829_v32, %v2476_v35  ;;  %vm848_vm4 = vcmp.eq.s32.totalorder %v2829_v32, %v2483_v38 }
  0xe5   : > { %v1366_v57 = vadd.f32 %v1969_v45, %v1226_v49  ;;  %v1935_v58 = vsel %vm1129_vm14, 1.0, %v2256_v1  ;;  %v1835_v16 = vsel %vm708_vm3, 1.0, %v2256_v1  ;;  %vm988_vm5 = vcmp.eq.s32.totalorder %v2829_v32, %v2491_v42 }
  0xe6   : > { %v1085_v59 = vadd.f32 %v1902_v48, %v945_v55  ;;  %v1968_v60 = vsel %vm1269_vm15, 1.0, %v2256_v1  ;;  %v664_v61 = vadd.f32 %v1802_v54, %v524_v56  ;;  %v1868_v3 = vsel %vm848_vm4, 1.0, %v2256_v1 }
  0xe7   : > { %1419 = vmatprep.subr.mxu0 %v1366_v57  ;;  %v1901_v5 = vsel %vm988_vm5, 1.0, %v2256_v1  ;;  %vm1128_vm6 = vcmp.eq.s32.totalorder %v2829_v32, %v2503_v50  ;;  %vm287_vm7 = vcmp.eq.s32.totalorder %v2829_v32, %v2457_v26  ;;  %vm427_vm8 = vcmp.eq.s32.totalorder %v2829_v32, %v2462_v30  ;;  %2006 = vmatprep.subr.mxu1 %v1366_v57 }
  0xe8   : > { %v1225_v11 = vadd.f32 %v1935_v58, %v1085_v59  ;;  %v804_v22 = vadd.f32 %v1835_v16, %v664_v61  ;;  %vm1268_vm9 = vcmp.eq.s32.totalorder %v2829_v32, %v2511_v52  ;;  %v1735_v29 = vsel %vm287_vm7, 1.0, %v2256_v1 }
  0xe9   : > { %v1768_v15 = vsel %vm427_vm8, 1.0, %v2256_v1  ;;  %vm567_vm10 = vcmp.eq.s32.totalorder %v2829_v32, %v2526_v62  ;;  %vm707_vm11 = vcmp.eq.s32.totalorder %v2829_v32, %v2530_v63  ;;  %vm847_vm12 = vcmp.eq.s32.totalorder %v2829_v32, %v2535_v7 }
  0xea   : > { %v1365_v10 = vadd.f32 %v1968_v60, %v1225_v11  ;;  %v944_v19 = vadd.f32 %v1868_v3, %v804_v22  ;;  %v523_v20 = vadd.f32 %v1768_v15, %v1735_v29  ;;  %v1801_v24 = vsel %vm567_vm10, 1.0, %v2256_v1 }
  0xeb   : > { %v1934_v9 = vsel %vm1128_vm6, 1.0, %v2256_v1  ;;  %v1834_v25 = vsel %vm707_vm11, 1.0, %v2256_v1  ;;  %vm987_vm13 = vcmp.eq.s32.totalorder %v2829_v32, %v2545_v8  ;;  %vm1127_vm14 = vcmp.eq.s32.totalorder %v2829_v32, %v2557_v17 }
  0xec   : > { %1420 = vmatpush1.msra.mxu0 %v1365_v10  ;;  %v1084_v18 = vadd.f32 %v1901_v5, %v944_v19  ;;  %v1967_v13 = vsel %vm1268_vm9, 1.0, %v2256_v1  ;;  %v663_v14 = vadd.f32 %v1801_v24, %v523_v20  ;;  %v1867_v6 = vsel %vm847_vm12, 1.0, %v2256_v1  ;;  %2022 = vmatpush1.msra.mxu1 %v1365_v10 }
  0xed   : > { %v1900_v28 = vsel %vm987_vm13, 1.0, %v2256_v1  ;;  %v1933_v34 = vsel %vm1127_vm14, 1.0, %v2256_v1  ;;  %vm1267_vm15 = vcmp.eq.s32.totalorder %v2829_v32, %v2565_v21  ;;  %v3154_v36 = vadd.s32 32, %v2418_v2 }
  0xee   : > { %v1224_v4 = vadd.f32 %v1934_v9, %v1084_v18  ;;  %v803_v37 = vadd.f32 %v1834_v25, %v663_v14  ;;  %v3157_v39 = vadd.s32 24, %v2418_v2  ;;  %v3160_v40 = vadd.s32 16, %v2418_v2 }
  0xef   : > { %vm286_vm0 = vcmp.eq.s32.totalorder %v3154_v36, %v2454_v23  ;;  %vm426_vm1 = vcmp.eq.s32.totalorder %v3154_v36, %v2459_v27  ;;  %vm566_vm2 = vcmp.eq.s32.totalorder %v3154_v36, %v2468_v31  ;;  %vm706_vm3 = vcmp.eq.s32.totalorder %v3154_v36, %v2476_v35 }
  0xf0   : > { %v1364_v32 = vadd.f32 %v1967_v13, %v1224_v4  ;;  %v943_v41 = vadd.f32 %v1867_v6, %v803_v37  ;;  %v1734_v43 = vsel %vm286_vm0, 1.0, %v2256_v1  ;;  %v1767_v44 = vsel %vm426_vm1, 1.0, %v2256_v1 }
  0xf1   : > { %v1966_v45 = vsel %vm1267_vm15, 1.0, %v2256_v1  ;;  %v522_v46 = vadd.f32 %v1767_v44, %v1734_v43  ;;  %v1800_v12 = vsel %vm566_vm2, 1.0, %v2256_v1  ;;  %vm846_vm4 = vcmp.eq.s32.totalorder %v3154_v36, %v2483_v38 }
  0xf2   : > { %1421 = vmatprep.subr.mxu0 %v1364_v32  ;;  %v1083_v47 = vadd.f32 %v1900_v28, %v943_v41  ;;  %v1833_v48 = vsel %vm706_vm3, 1.0, %v2256_v1  ;;  %vm986_vm5 = vcmp.eq.s32.totalorder %v3154_v36, %v2491_v42  ;;  %v3180_v33 = vadd.s32 8, %v2418_v2  ;;  %2007 = vmatprep.subr.mxu1 %v1364_v32 }
  0xf3   : > { %v662_v49 = vadd.f32 %v1800_v12, %v522_v46  ;;  %v1866_v51 = vsel %vm846_vm4, 1.0, %v2256_v1  ;;  %v1899_v53 = vsel %vm986_vm5, 1.0, %v2256_v1  ;;  %vm1126_vm6 = vcmp.eq.s32.totalorder %v3154_v36, %v2503_v50 }
  0xf4   : > { %v1223_v54 = vadd.f32 %v1933_v34, %v1083_v47  ;;  %vm1266_vm7 = vcmp.eq.s32.totalorder %v3154_v36, %v2511_v52  ;;  %vm285_vm8 = vcmp.eq.s32.totalorder %v3154_v36, %v2457_v26  ;;  %vm425_vm9 = vcmp.eq.s32.totalorder %v3154_v36, %v2462_v30 }
  0xf5   : > { %v802_v55 = vadd.f32 %v1833_v48, %v662_v49  ;;  %v1733_v56 = vsel %vm285_vm8, 1.0, %v2256_v1  ;;  %v1766_v57 = vsel %vm425_vm9, 1.0, %v2256_v1  ;;  %vm565_vm10 = vcmp.eq.s32.totalorder %v3154_v36, %v2526_v62 }
  0xf6   : > { %v1363_v58 = vadd.f32 %v1966_v45, %v1223_v54  ;;  %v521_v16 = vadd.f32 %v1766_v57, %v1733_v56  ;;  %v1799_v59 = vsel %vm565_vm10, 1.0, %v2256_v1  ;;  %vm705_vm11 = vcmp.eq.s32.totalorder %v3154_v36, %v2530_v63 }
  0xf7   : > { %v942_v60 = vadd.f32 %v1866_v51, %v802_v55  ;;  %v1832_v61 = vsel %vm705_vm11, 1.0, %v2256_v1  ;;  %vm845_vm12 = vcmp.eq.s32.totalorder %v3154_v36, %v2535_v7  ;;  %vm985_vm13 = vcmp.eq.s32.totalorder %v3154_v36, %v2545_v8 }
  0xf8   : > { %1422 = vmatpush1.msra.mxu0 %v1363_v58  ;;  %v1932_v3 = vsel %vm1126_vm6, 1.0, %v2256_v1  ;;  %v1965_v5 = vsel %vm1266_vm7, 1.0, %v2256_v1  ;;  %v661_v11 = vadd.f32 %v1799_v59, %v521_v16  ;;  %v1865_v22 = vsel %vm845_vm12, 1.0, %v2256_v1  ;;  %2023 = vmatpush1.msra.mxu1 %v1363_v58 }
  0xf9   : > { %v1082_v29 = vadd.f32 %v1899_v53, %v942_v60  ;;  %v1898_v15 = vsel %vm985_vm13, 1.0, %v2256_v1  ;;  %vm1125_vm14 = vcmp.eq.s32.totalorder %v3154_v36, %v2557_v17  ;;  %vm284_vm15 = vcmp.eq.s32.totalorder %v3157_v39, %v2454_v23 }
  0xfa   : > { %v801_v10 = vadd.f32 %v1832_v61, %v661_v11  ;;  %vm1265_vm0 = vcmp.eq.s32.totalorder %v3154_v36, %v2565_v21  ;;  %v1732_v19 = vsel %vm284_vm15, 1.0, %v2256_v1  ;;  %vm424_vm1 = vcmp.eq.s32.totalorder %v3157_v39, %v2459_v27 }
  0xfb   : > { %v1222_v20 = vadd.f32 %v1932_v3, %v1082_v29  ;;  %v1765_v24 = vsel %vm424_vm1, 1.0, %v2256_v1  ;;  %vm564_vm2 = vcmp.eq.s32.totalorder %v3157_v39, %v2468_v31  ;;  %vm704_vm3 = vcmp.eq.s32.totalorder %v3157_v39, %v2476_v35 }
  0xfc   : > { %v941_v9 = vadd.f32 %v1865_v22, %v801_v10  ;;  %v1931_v25 = vsel %vm1125_vm14, 1.0, %v2256_v1  ;;  %v520_v18 = vadd.f32 %v1765_v24, %v1732_v19  ;;  %v1798_v13 = vsel %vm564_vm2, 1.0, %v2256_v1 }
  0xfd   : > { %v1362_v14 = vadd.f32 %v1965_v5, %v1222_v20  ;;  %v1831_v6 = vsel %vm704_vm3, 1.0, %v2256_v1  ;;  %vm844_vm4 = vcmp.eq.s32.totalorder %v3157_v39, %v2483_v38  ;;  %vm984_vm5 = vcmp.eq.s32.totalorder %v3157_v39, %v2491_v42 }
  0xfe   : > { %v1081_v28 = vadd.f32 %v1898_v15, %v941_v9  ;;  %v1964_v34 = vsel %vm1265_vm0, 1.0, %v2256_v1  ;;  %v660_v4 = vadd.f32 %v1798_v13, %v520_v18  ;;  %vm1124_vm6 = vcmp.eq.s32.totalorder %v3157_v39, %v2503_v50 }
  0xff   : > { %1423 = vmatprep.subr.mxu0 %v1362_v14  ;;  %v1864_v37 = vsel %vm844_vm4, 1.0, %v2256_v1  ;;  %v1897_v32 = vsel %vm984_vm5, 1.0, %v2256_v1  ;;  %vm283_vm7 = vcmp.eq.s32.totalorder %v3157_v39, %v2457_v26  ;;  %vm423_vm8 = vcmp.eq.s32.totalorder %v3157_v39, %v2462_v30  ;;  %2008 = vmatprep.subr.mxu1 %v1362_v14 }
 0x100   : > { %v1221_v41 = vadd.f32 %v1931_v25, %v1081_v28  ;;  %v800_v43 = vadd.f32 %v1831_v6, %v660_v4  ;;  %vm1264_vm9 = vcmp.eq.s32.totalorder %v3157_v39, %v2511_v52  ;;  %v1731_v36 = vsel %vm283_vm7, 1.0, %v2256_v1 }
 0x101   : > { %v1764_v44 = vsel %vm423_vm8, 1.0, %v2256_v1  ;;  %vm563_vm10 = vcmp.eq.s32.totalorder %v3157_v39, %v2526_v62  ;;  %vm703_vm11 = vcmp.eq.s32.totalorder %v3157_v39, %v2530_v63  ;;  %vm843_vm12 = vcmp.eq.s32.totalorder %v3157_v39, %v2535_v7 }
 0x102   : > { %v1361_v45 = vadd.f32 %v1964_v34, %v1221_v41  ;;  %v940_v46 = vadd.f32 %v1864_v37, %v800_v43  ;;  %v519_v12 = vadd.f32 %v1764_v44, %v1731_v36  ;;  %v1797_v47 = vsel %vm563_vm10, 1.0, %v2256_v1 }
 0x103   : > { %v1930_v48 = vsel %vm1124_vm6, 1.0, %v2256_v1  ;;  %v1963_v49 = vsel %vm1264_vm9, 1.0, %v2256_v1  ;;  %v1830_v51 = vsel %vm703_vm11, 1.0, %v2256_v1  ;;  %vm983_vm13 = vcmp.eq.s32.totalorder %v3157_v39, %v2545_v8 }
 0x104   : > { %1424 = vmatpush1.msra.mxu0 %v1361_v45  ;;  %v1080_v53 = vadd.f32 %v1897_v32, %v940_v46  ;;  %v659_v54 = vadd.f32 %v1797_v47, %v519_v12  ;;  %v1863_v55 = vsel %vm843_vm12, 1.0, %v2256_v1  ;;  %vm1123_vm14 = vcmp.eq.s32.totalorder %v3157_v39, %v2557_v17  ;;  %2024 = vmatpush1.msra.mxu1 %v1361_v45 }
 0x105   : > { %v1896_v56 = vsel %vm983_vm13, 1.0, %v2256_v1  ;;  %vm282_vm15 = vcmp.eq.s32.totalorder %v3160_v40, %v2454_v23  ;;  %vm422_vm0 = vcmp.eq.s32.totalorder %v3160_v40, %v2459_v27  ;;  %vm562_vm1 = vcmp.eq.s32.totalorder %v3160_v40, %v2468_v31 }
 0x106   : > { %v1220_v57 = vadd.f32 %v1930_v48, %v1080_v53  ;;  %v799_v58 = vadd.f32 %v1830_v51, %v659_v54  ;;  %vm1263_vm2 = vcmp.eq.s32.totalorder %v3157_v39, %v2565_v21  ;;  %v1730_v16 = vsel %vm282_vm15, 1.0, %v2256_v1 }
 0x107   : > { %v1763_v59 = vsel %vm422_vm0, 1.0, %v2256_v1  ;;  %v1796_v60 = vsel %vm562_vm1, 1.0, %v2256_v1  ;;  %vm702_vm3 = vcmp.eq.s32.totalorder %v3160_v40, %v2476_v35  ;;  %vm842_vm4 = vcmp.eq.s32.totalorder %v3160_v40, %v2483_v38 }
 0x108   : > { %v1360_v61 = vadd.f32 %v1963_v49, %v1220_v57  ;;  %v939_v3 = vadd.f32 %v1863_v55, %v799_v58  ;;  %v1929_v5 = vsel %vm1123_vm14, 1.0, %v2256_v1  ;;  %v518_v11 = vadd.f32 %v1763_v59, %v1730_v16 }
 0x109   : > { %v1962_v22 = vsel %vm1263_vm2, 1.0, %v2256_v1  ;;  %v1829_v29 = vsel %vm702_vm3, 1.0, %v2256_v1  ;;  %vm982_vm5 = vcmp.eq.s32.totalorder %v3160_v40, %v2491_v42  ;;  %vm1122_vm6 = vcmp.eq.s32.totalorder %v3160_v40, %v2503_v50 }
 0x10a   : > { %1425 = vmatprep.subr.mxu0 %v1360_v61  ;;  %v1079_v15 = vadd.f32 %v1896_v56, %v939_v3  ;;  %v658_v10 = vadd.f32 %v1796_v60, %v518_v11  ;;  %v1862_v19 = vsel %vm842_vm4, 1.0, %v2256_v1  ;;  %vm1262_vm7 = vcmp.eq.s32.totalorder %v3160_v40, %v2511_v52  ;;  %2009 = vmatprep.subr.mxu1 %v1360_v61 }
 0x10b   : > { %v1895_v39 = vsel %vm982_vm5, 1.0, %v2256_v1  ;;  %vm281_vm8 = vcmp.eq.s32.totalorder %v3160_v40, %v2457_v26  ;;  %vm421_vm9 = vcmp.eq.s32.totalorder %v3160_v40, %v2462_v30  ;;  %vm561_vm10 = vcmp.eq.s32.totalorder %v3160_v40, %v2526_v62 }
 0x10c   : > { %v1219_v20 = vadd.f32 %v1929_v5, %v1079_v15  ;;  %v798_v24 = vadd.f32 %v1829_v29, %v658_v10  ;;  %v1729_v9 = vsel %vm281_vm8, 1.0, %v2256_v1  ;;  %v1762_v25 = vsel %vm421_vm9, 1.0, %v2256_v1 }
 0x10d   : > { %v517_v18 = vadd.f32 %v1762_v25, %v1729_v9  ;;  %v1795_v13 = vsel %vm561_vm10, 1.0, %v2256_v1  ;;  %vm701_vm11 = vcmp.eq.s32.totalorder %v3160_v40, %v2530_v63  ;;  %vm841_vm12 = vcmp.eq.s32.totalorder %v3160_v40, %v2535_v7 }
 0x10e   : > { %v1359_v14 = vadd.f32 %v1962_v22, %v1219_v20  ;;  %v938_v6 = vadd.f32 %v1862_v19, %v798_v24  ;;  %v1928_v28 = vsel %vm1122_vm6, 1.0, %v2256_v1  ;;  %v1828_v34 = vsel %vm701_vm11, 1.0, %v2256_v1 }
 0x10f   : > { %v1961_v4 = vsel %vm1262_vm7, 1.0, %v2256_v1  ;;  %v657_v37 = vadd.f32 %v1795_v13, %v517_v18  ;;  %v1861_v32 = vsel %vm841_vm12, 1.0, %v2256_v1  ;;  %vm981_vm13 = vcmp.eq.s32.totalorder %v3160_v40, %v2545_v8 }
 0x110   : > { %1426 = vmatpush1.msra.mxu0 %v1359_v14  ;;  %v1078_v41 = vadd.f32 %v1895_v39, %v938_v6  ;;  %v1894_v43 = vsel %vm981_vm13, 1.0, %v2256_v1  ;;  %vm1121_vm14 = vcmp.eq.s32.totalorder %v3160_v40, %v2557_v17  ;;  %vm1261_vm15 = vcmp.eq.s32.totalorder %v3160_v40, %v2565_v21  ;;  %2025 = vmatpush1.msra.mxu1 %v1359_v14 }
 0x111   : > { %v797_v36 = vadd.f32 %v1828_v34, %v657_v37  ;;  %vm280_vm0 = vcmp.eq.s32.totalorder %v3180_v33, %v2454_v23  ;;  %vm420_vm1 = vcmp.eq.s32.totalorder %v3180_v33, %v2459_v27  ;;  %vm560_vm2 = vcmp.eq.s32.totalorder %v3180_v33, %v2468_v31 }
 0x112   : > { %v1218_v44 = vadd.f32 %v1928_v28, %v1078_v41  ;;  %v1728_v45 = vsel %vm280_vm0, 1.0, %v2256_v1  ;;  %v1761_v46 = vsel %vm420_vm1, 1.0, %v2256_v1  ;;  %v1794_v12 = vsel %vm560_vm2, 1.0, %v2256_v1 }
 0x113   : > { %v937_v47 = vadd.f32 %v1861_v32, %v797_v36  ;;  %v516_v48 = vadd.f32 %v1761_v46, %v1728_v45  ;;  %vm700_vm3 = vcmp.eq.s32.totalorder %v3180_v33, %v2476_v35  ;;  %vm840_vm4 = vcmp.eq.s32.totalorder %v3180_v33, %v2483_v38 }
 0x114   : > { %v1358_v49 = vadd.f32 %v1961_v4, %v1218_v44  ;;  %v1927_v51 = vsel %vm1121_vm14, 1.0, %v2256_v1  ;;  %v1827_v53 = vsel %vm700_vm3, 1.0, %v2256_v1  ;;  %vm980_vm5 = vcmp.eq.s32.totalorder %v3180_v33, %v2491_v42 }
 0x115   : > { %v1077_v54 = vadd.f32 %v1894_v43, %v937_v47  ;;  %v1960_v55 = vsel %vm1261_vm15, 1.0, %v2256_v1  ;;  %v656_v56 = vadd.f32 %v1794_v12, %v516_v48  ;;  %v1860_v57 = vsel %vm840_vm4, 1.0, %v2256_v1 }
 0x116   : > { %1427 = vmatprep.subr.mxu0 %v1358_v49  ;;  %v1893_v58 = vsel %vm980_vm5, 1.0, %v2256_v1  ;;  %vm1120_vm6 = vcmp.eq.s32.totalorder %v3180_v33, %v2503_v50  ;;  %vm279_vm7 = vcmp.eq.s32.totalorder %v3180_v33, %v2457_v26  ;;  %vm419_vm8 = vcmp.eq.s32.totalorder %v3180_v33, %v2462_v30  ;;  %2010 = vmatprep.subr.mxu1 %v1358_v49 }
 0x117   : > { %v1217_v16 = vadd.f32 %v1927_v51, %v1077_v54  ;;  %v796_v59 = vadd.f32 %v1827_v53, %v656_v56  ;;  %vm1260_vm9 = vcmp.eq.s32.totalorder %v3180_v33, %v2511_v52  ;;  %v1727_v40 = vsel %vm279_vm7, 1.0, %v2256_v1  ;;  %v1385_v54 = vld [vmem:[#allocation8] sm:$0xff]  ;;  %v1387_v56 = vld [vmem:[#allocation8 + $0x10] sm:$0xff] }
 0x118   : > { %v1760_v60 = vsel %vm419_vm8, 1.0, %v2256_v1  ;;  %vm559_vm10 = vcmp.eq.s32.totalorder %v3180_v33, %v2526_v62  ;;  %vm699_vm11 = vcmp.eq.s32.totalorder %v3180_v33, %v2530_v63  ;;  %vm839_vm12 = vcmp.eq.s32.totalorder %v3180_v33, %v2535_v7 }
 0x119   : > { %v1357_v61 = vadd.f32 %v1960_v55, %v1217_v16  ;;  %v936_v3 = vadd.f32 %v1860_v57, %v796_v59  ;;  %v515_v5 = vadd.f32 %v1760_v60, %v1727_v40  ;;  %v1793_v11 = vsel %vm559_vm10, 1.0, %v2256_v1  ;;  %v1393_v55 = vld [vmem:[#allocation8 + $0x40] sm:$0xff]  ;;  %v1395_v57 = vld [vmem:[#allocation8 + $0x50] sm:$0xff]  ;;  %v1396_v16 = vld [vmem:[#allocation8 + $0x58] sm:$0xff] }
 0x11a   : > { %v1926_v22 = vsel %vm1120_vm6, 1.0, %v2256_v1  ;;  %v1959_v29 = vsel %vm1260_vm9, 1.0, %v2256_v1  ;;  %v1826_v15 = vsel %vm699_vm11, 1.0, %v2256_v1  ;;  %vm979_vm13 = vcmp.eq.s32.totalorder %v3180_v33, %v2545_v8  ;;  %v1389_v59 = vld [vmem:[#allocation8 + $0x20] sm:$0xff]  ;;  %v1390_v60 = vld [vmem:[#allocation8 + $0x28] sm:$0xff] }
 0x11b   : > { %1428 = vmatpush1.msra.mxu0 %v1357_v61  ;;  %v1076_v10 = vadd.f32 %v1893_v58, %v936_v3  ;;  %v655_v19 = vadd.f32 %v1793_v11, %v515_v5  ;;  %v1859_v39 = vsel %vm839_vm12, 1.0, %v2256_v1  ;;  %vm1119_vm14 = vcmp.eq.s32.totalorder %v3180_v33, %v2557_v17  ;;  %2026 = vmatpush1.msra.mxu1 %v1357_v61  ;;  %v1388_v58 = vld [vmem:[#allocation8 + $0x18] sm:$0xff]  ;;  %v1397_v40 = vld [vmem:[#allocation8 + $0x60] sm:$0xff]  ;;  %v1398_v61 = vld [vmem:[#allocation8 + $0x68] sm:$0xff] }
 0x11c   : > { %v1892_v20 = vsel %vm979_vm13, 1.0, %v2256_v1  ;;  %vm278_vm15 = vcmp.eq.s32.totalorder %v2418_v2, %v2454_v23  ;;  %vm418_vm0 = vcmp.eq.s32.totalorder %v2418_v2, %v2459_v27  ;;  %vm558_vm1 = vcmp.eq.s32.totalorder %v2418_v2, %v2468_v31  ;;  %v1391_v3 = vld [vmem:[#allocation8 + $0x30] sm:$0xff]  ;;  %v1392_v11 = vld [vmem:[#allocation8 + $0x38] sm:$0xff] }
 0x11d   : > { %v1216_v24 = vadd.f32 %v1926_v22, %v1076_v10  ;;  %v795_v9 = vadd.f32 %v1826_v15, %v655_v19  ;;  %vm1259_vm2 = vcmp.eq.s32.totalorder %v3180_v33, %v2565_v21  ;;  %v1726_v25 = vsel %vm278_vm15, 1.0, %v2256_v1  ;;  %v1399_v5 = vld [vmem:[#allocation8 + $0x70] sm:$0xff]  ;;  %v1400_v22 = vld [vmem:[#allocation8 + $0x78] sm:$0xff] }
 0x11e   : > { %v1759_v18 = vsel %vm418_vm0, 1.0, %v2256_v1  ;;  %v1792_v13 = vsel %vm558_vm1, 1.0, %v2256_v1  ;;  %vm698_vm3 = vcmp.eq.s32.totalorder %v2418_v2, %v2476_v35  ;;  %vm838_vm4 = vcmp.eq.s32.totalorder %v2418_v2, %v2483_v38 }
 0x11f   : > { %v1356_v23 = vadd.f32 %v1959_v29, %v1216_v24  ;;  %v935_v27 = vadd.f32 %v1859_v39, %v795_v9  ;;  %v514_v31 = vadd.f32 %v1759_v18, %v1726_v25  ;;  %v1925_v14 = vsel %vm1119_vm14, 1.0, %v2256_v1 }
 0x120   : > { %v1958_v6 = vsel %vm1259_vm2, 1.0, %v2256_v1  ;;  %v1825_v28 = vsel %vm698_vm3, 1.0, %v2256_v1  ;;  %vm978_vm5 = vcmp.eq.s32.totalorder %v2418_v2, %v2491_v42  ;;  %v1858_v38 = vsel %vm838_vm4, 1.0, %v2256_v1 }
 0x121   : > { %1429 = vmatprep.subr.mxu0 %v1356_v23  ;;  %v1075_v35 = vadd.f32 %v1892_v20, %v935_v27  ;;  %v654_v34 = vadd.f32 %v1792_v13, %v514_v31  ;;  %vm1118_vm6 = vcmp.eq.s32.totalorder %v2418_v2, %v2503_v50  ;;  %2011 = vmatprep.subr.mxu1 %v1356_v23  ;;  %v1891_v4 = vsel %vm978_vm5, 1.0, %v2256_v1 }
 0x122   : > { %vm277_vm7 = vcmp.eq.s32.totalorder %v2418_v2, %v2457_v26  ;;  %vm417_vm8 = vcmp.eq.s32.totalorder %v2418_v2, %v2462_v30  ;;  %vm557_vm9 = vcmp.eq.s32.totalorder %v2418_v2, %v2526_v62  ;;  %vm697_vm10 = vcmp.eq.s32.totalorder %v2418_v2, %v2530_v63 }
 0x123   : > { %v1215_v42 = vadd.f32 %v1925_v14, %v1075_v35  ;;  %v794_v33 = vadd.f32 %v1825_v28, %v654_v34  ;;  %v1725_v37 = vsel %vm277_vm7, 1.0, %v2256_v1  ;;  %v1758_v32 = vsel %vm417_vm8, 1.0, %v2256_v1 }
 0x124   : > { %v513_v41 = vadd.f32 %v1758_v32, %v1725_v37  ;;  %v1791_v43 = vsel %vm557_vm9, 1.0, %v2256_v1  ;;  %vm837_vm11 = vcmp.eq.s32.totalorder %v2418_v2, %v2535_v7  ;;  %vm1258_vm12 = vcmp.eq.s32.totalorder %v2418_v2, %v2511_v52 }
 0x125   : > { %v1355_v26 = vadd.f32 %v1958_v6, %v1215_v42  ;;  %v934_v30 = vadd.f32 %v1858_v38, %v794_v33  ;;  %v1824_v62 = vsel %vm697_vm10, 1.0, %v2256_v1  ;;  %v1924_v36 = vsel %vm1118_vm6, 1.0, %v2256_v1 }
 0x126   : > { %v653_v44 = vadd.f32 %v1791_v43, %v513_v41  ;;  %vm977_vm13 = vcmp.eq.s32.totalorder %v2418_v2, %v2545_v8  ;;  %v1857_v7 = vsel %vm837_vm11, 1.0, %v2256_v1  ;;  %v1957_v45 = vsel %vm1258_vm12, 1.0, %v2256_v1 }
 0x127   : > { %1430 = vmatpush1.msra.mxu0 %v1355_v26  ;;  %v1074_v63 = vadd.f32 %v1891_v4, %v934_v30  ;;  %2027 = vmatpush1.msra.mxu1 %v1355_v26  ;;  %vm1117_vm14 = vcmp.eq.s32.totalorder %v2418_v2, %v2557_v17  ;;  %v1890_v12 = vsel %vm977_vm13, 1.0, %v2256_v1  ;;  %vm1257_vm15 = vcmp.eq.s32.totalorder %v2418_v2, %v2565_v21  ;;  %v1386_v17 = vld [vmem:[#allocation8 + $0x8] sm:$0xff] }
 0x128   : > { %v793_v46 = vadd.f32 %v1824_v62, %v653_v44  ;;  %v1923_v8 = vsel %vm1117_vm14, 1.0, %v2256_v1  ;;  %v1956_v49 = vsel %vm1257_vm15, 1.0, %v2256_v1  ;;  %v1394_v21 = vld [vmem:[#allocation8 + $0x48] sm:$0xff]  ;;  %vm1602_vm0 = vcmp.lt.s32.totalorder %v248_v0, 256 }
 0x129   : > { %v1214_v52 = vadd.f32 %v1924_v36, %v1074_v63 }
 0x12a   : > { %v933_v50 = vadd.f32 %v1857_v7, %v793_v46 }
 0x12b   : > { %v1354_v47 = vadd.f32 %v1957_v45, %v1214_v52 }
 0x12c   : > { %v1073_v48 = vadd.f32 %v1890_v12, %v933_v50 }
 0x12d   : > { %1431 = vmatprep.subr.mxu0 %v1354_v47  ;;  %2012 = vmatprep.subr.mxu1 %v1354_v47 }
 0x12e   : > { %v1213_v51 = vadd.f32 %v1923_v8, %v1073_v48  ;;  %v1565_v8 = vstv %s3456_s13 }
 0x130   : > { %v1353_v53 = vadd.f32 %v1956_v49, %v1213_v51 }
 0x132   : > { %1432 = vmatpush1.msra.mxu0 %v1353_v53  ;;  %2028 = vmatpush1.msra.mxu1 %v1353_v53 }
 0x133   : > { %1466 = vmatmul.mubr.f32.vlgmr.msra.gmra.mxu0 %v1385_v54  ;;  %1508 = vmatmul.mubr.f32.vlgmr.msra.gmra.mxu1 %v1393_v55 }
 0x134   : > { %1471 = vmatprep.mubr.f32.mxu0 %v2256_v1  ;;  %1511 = vmatprep.mubr.f32.mxu1 %v2256_v1 }
 0x137   : > { %1472 = vmatmul.mubr.f32.gmra.mxu0 %v1386_v17  ;;  %1512 = vmatmul.mubr.f32.gmra.mxu1 %v1394_v21 }
 0x138   : > { %1477 = vmatprep.mubr.f32.mxu0 %v2256_v1  ;;  %1515 = vmatprep.mubr.f32.mxu1 %v2256_v1 }
 0x13b   : > { %1478 = vmatmul.mubr.f32.gmra.mxu0 %v1387_v56  ;;  %1516 = vmatmul.mubr.f32.gmra.mxu1 %v1395_v57 }
 0x13c   : > { %1483 = vmatprep.mubr.f32.mxu0 %v2256_v1  ;;  %1519 = vmatprep.mubr.f32.mxu1 %v2256_v1 }
 0x13f   : > { %1484 = vmatmul.mubr.f32.gmra.mxu0 %v1388_v58  ;;  %1520 = vmatmul.mubr.f32.gmra.mxu1 %v1396_v16 }
 0x140   : > { %1489 = vmatprep.mubr.f32.mxu0 %v2256_v1  ;;  %1523 = vmatprep.mubr.f32.mxu1 %v2256_v1 }
 0x143   : > { %1490 = vmatmul.mubr.f32.gmra.mxu0 %v1389_v59  ;;  %1524 = vmatmul.mubr.f32.gmra.mxu1 %v1397_v40 }
 0x144   : > { %1495 = vmatprep.mubr.f32.mxu0 %v2256_v1  ;;  %1527 = vmatprep.mubr.f32.mxu1 %v2256_v1 }
 0x147   : > { %1496 = vmatmul.mubr.f32.gmra.mxu0 %v1390_v60  ;;  %1528 = vmatmul.mubr.f32.gmra.mxu1 %v1398_v61 }
 0x148   : > { %1499 = vmatprep.mubr.f32.mxu0 %v2256_v1  ;;  %1531 = vmatprep.mubr.f32.mxu1 %v2256_v1 }
 0x14b   : > { %1500 = vmatmul.mubr.f32.gmra.mxu0 %v1391_v3  ;;  %1532 = vmatmul.mubr.f32.gmra.mxu1 %v1399_v5 }
 0x14c   : > { %1503 = vmatprep.mubr.f32.mxu0 %v2256_v1  ;;  %1535 = vmatprep.mubr.f32.mxu1 %v2256_v1 }
 0x14f   : > { %1504 = vmatmul.mubr.f32.gmra.mxu0 %v1392_v11  ;;  %1536 = vmatmul.mubr.f32.gmra.mxu1 %v1400_v22 }
 0x1f3   : > { %v1467_v29 = vpop.f32.mrf.mxu0  ;;  %v1509_v15 = vpop.f32.mrf.mxu1 }
 0x1f4   : > { %v1540_v27 = vmul.f32 %v1467_v29, %v1467_v29 }
 0x1f5   : > { %v1469_v10 = vpop.f32.mrf.mxu0  ;;  %v1510_v19 = vpop.f32.mrf.mxu1 }
 0x1f6   : > { %v1541_v6 = vmul.f32 %v1469_v10, %v1469_v10 }
 0x1f7   : > { %v1473_v39 = vpop.f32.mrf.mxu0  ;;  %v1513_v20 = vpop.f32.mrf.mxu1 }
 0x1f8   : > { %v1542_v31 = vmul.f32 %v1473_v39, %v1473_v39  ;;  %v2257_v20 = vmov 1966171168  }
 0x1f9   : > { %v1475_v24 = vpop.f32.mrf.mxu0  ;;  %v1514_v9 = vpop.f32.mrf.mxu1 }
 0x1fa   : > { %v1543_v28 = vmul.f32 %v1475_v24, %v1475_v24  ;;  %v1586_v24 = vunpack.c.l.s4 %v2257_v20 }
 0x1fb   : > { %v1479_v25 = vpop.f32.mrf.mxu0  ;;  %v1517_v18 = vpop.f32.mrf.mxu1 }
 0x1fc   : > { %v1544_v35 = vsub.f32 %v1540_v27, %v1479_v25  ;;  %v1587_v9 = vunpack.c.0.s8 %v1586_v24 }
 0x1fd   : > { %v1481_v13 = vpop.f32.mrf.mxu0  ;;  %v1518_v23 = vpop.f32.mrf.mxu1 }
 0x1fe   : > { %v1545_v42 = vsub.f32 %v1541_v6, %v1481_v13  ;;  %v1590_v18 = vsub.s32 %v1587_v9, %v2418_v2 }
 0x1ff   : > { %v1485_v14 = vpop.f32.mrf.mxu0  ;;  %v1521_v1 = vpop.f32.mrf.mxu1 }
 0x200   : > { %v1546_v34 = vsub.f32 %v1542_v31, %v1485_v14 }
 0x201   : > { %v1487_v38 = vpop.f32.mrf.mxu0  ;;  %v1522_v4 = vpop.f32.mrf.mxu1 }
 0x202   : > { %v1548_v33 = vadd.f32 %v1546_v34, %v1544_v35  ;;  %v1547_v37 = vsub.f32 %v1543_v28, %v1487_v38 }
 0x203   : > { %v1491_v32 = vpop.f32.mrf.mxu0  ;;  %v1525_v41 = vpop.f32.mrf.mxu1 }
 0x204   : > { %v1549_v43 = vrot.slane %v1548_v33, 4  ;;  %v1555_v26 = vadd.f32 %v1547_v37, %v1545_v42  ;;  %v1566_v21 = vadd.f32 %v1565_v8, %v1491_v32 }
 0x205   : > { %v1493_v30 = vpop.f32.mrf.mxu0  ;;  %v1526_v62 = vpop.f32.mrf.mxu1 }
 0x206   : > { %v1550_v36 = vadd.f32 %v1549_v43, %v1548_v33  ;;  %v1556_v44 = vrot.slane %v1555_v26, 4  ;;  %v1567_v5 = vadd.f32 %v1565_v8, %v1493_v30 }
 0x207   : > { %v1497_v63 = vpop.f32.mrf.mxu0  ;;  %v1529_v7 = vpop.f32.mrf.mxu1 }
 0x208   : > { %v1551_v45 = vrot.slane %v1550_v36, 2  ;;  %v1557_v46 = vadd.f32 %v1556_v44, %v1555_v26 }
 0x209   : > { %v1498_v52 = vpop.f32.mrf.mxu0  ;;  %v1530_v12 = vpop.f32.mrf.mxu1 }
 0x20a   : > { %v1552_v50 = vadd.f32 %v1551_v45, %v1550_v36  ;;  %v1558_v47 = vrot.slane %v1557_v46, 2 }
 0x20b   : > { %v1501_v48 = vpop.f32.mrf.mxu0  ;;  %v1533_v49 = vpop.f32.mrf.mxu1 }
 0x20c   : > { %v1559_v51 = vadd.f32 %v1558_v47, %v1557_v46  ;;  %v1553_v53 = vrot.slane %v1552_v50, 1 }
 0x20d   : > { %v1502_v54 = vpop.f32.mrf.mxu0  ;;  %v1534_v55 = vpop.f32.mrf.mxu1 }
 0x20e   : > { %v1554_v17 = vadd.f32 %v1553_v53, %v1552_v50  ;;  %v1560_v56 = vrot.slane %v1559_v51, 1 }
 0x20f   : > { %v1505_v57 = vpop.f32.mrf.mxu0  ;;  %v1537_v58 = vpop.f32.mrf.mxu1 }
 0x210   : > { %v1562_v16 = vmul.f32 0.5, %v1554_v17  ;;  %v1561_v59 = vadd.f32 %v1560_v56, %v1559_v51 }
 0x211   : > { %v1506_v40 = vpop.f32.mrf.mxu0  ;;  %v1538_v60 = vpop.f32.mrf.mxu1 }
 0x212   : > { %v1568_v61 = vadd.f32 %v1566_v21, %v1562_v16  ;;  %v1563_v3 = vmul.f32 0.5, %v1561_v59 }
 0x214   : > { %v1988_v11 = vmul.f32 -1.442695, %v1568_v61  ;;  %v1569_v22 = vadd.f32 %v1567_v5, %v1563_v3 }
 0x216   : > { %2100 = vpow2.f32 %v1988_v11  ;;  %v1989_v29 = vmul.f32 -1.442695, %v1569_v22 }
 0x218   : > { %2102 = vpow2.f32 %v1989_v29 }
 0x223   : > { %v2101_v15 = vpop.eup %2100 }
 0x224   : > { %v1576_v10 = vadd.f32 1.0, %v2101_v15 }
 0x225   : > { %v2103_v19 = vpop.eup %2102 }
 0x226   : > { %v1577_v39 = vadd.f32 1.0, %v2103_v19  ;;  %2104 = vrcp.f32 %v1576_v10 }
 0x228   : > { %2106 = vrcp.f32 %v1577_v39 }
 0x233   : > { %v2105_v25 = vpop.eup %2104 }
 0x235   : > { %v2107_v13 = vpop.eup %2106 }
 0x236   : > { %v1584_v23 = vcombine.low %v2105_v25, %v2107_v13 }
 0x238   : > { %v1591_v27 = vrot.slane %v1584_v23, %v1590_v18 }
 0x23a   : > { %v1598_v31 = vrot.slane %v1591_v27, %v1590_v18 }
 0x23c   : > { %1604 = vst.msk [vmem:[%s243_s21] sm:$0x3] %vm1602_vm0, %v1598_v31 }
 0x23d   : > { %2190 = shalt.err (!%p2187_p7)
}
 0x23e   : > { %s2191_s5 = scalar_lea.hbm %s1618_s8, 32  ;;  %s2195_s7 = scalar_lea.hbm %s3501_s4, 64 }
 0x23f   : > { %p2192_p10 = scmp.ne.s32.totalorder %s1618_s8, %s2191_s5  ;;  %p2196_p11 = scmp.lt.s32.totalorder %s1618_s8, %s3501_s4 }
 0x240   : > { %p2197_p12 = scmp.lt.s32.totalorder %s2195_s7, %s2191_s5 }
 0x241   : > { %p2193_p5 = pnand %p2192_p10, %p3519_p2 }
 0x242   : > { %p2198_p0 = por %p2197_p12, %p2196_p11 }
 0x243   : > { %p2194_p8 = pneg %p2193_p5 }
 0x245   : > { %p2199_p1 = pnand %p2198_p0, %p2194_p8 }
 0x247   : > { %2202 = shalt.err (!%p2199_p1)
}
 0x248   : > { %2039 = dma.vmem_to_hbm [thread:$0]  (%p3519_p2), %s1621_s25, 32, %s1618_s8, %s1606_s9  }
 0x249 PF: > { %s1632_s13 = sand.u32 1, %s2237_s17   ;;  %p3520_p4 = scmp.ne.s32.totalorder %s3507_s23, 0 }
 0x24a   : > { %p3521_p6 = scmp.ge.s32.totalorder %s2249_s20, 2  ;;  %s1633_s14 = scalar_lea.sflag [#allocation5], %s1632_s13 }
 0x24c   : > { %p2053_p9 = pnand %p3521_p6, %p3520_p4 }
 0x24e   : > { %p2054_p13 = pneg %p2053_p9 }
 0x250   : > { %2232 = dma.done.wait (%p2054_p13), %s1633_s14, 32  }
 0x251   : > { %2234 = vsyncadd (%p2054_p13), %s1633_s14, 4294967264  ;;  %p20_p3 = scmp.ge.s32.totalorder %s2353_s12, 4   ;;  %s3522_s17 = smov %s2241_s18 }
 0x252   : > { %s3523_s18 = smov %s2245_s19  ;;  %s3524_s19 = smov %s2369_s16 }
 0x253   : > { %s3525_s20 = smov %s2353_s12  ;;  %22 = sbr.rel (!%p20_p3) target bundleno = 9 (0x9), region = 90 }
 0x258   :  { %1638 = vsyncpa [#allocation4], 1 }
 0x259   :  { %1640 = vsyncpa [#allocation4 + $0x1], 1 }
 0x25a   :  { %1641 = vsyncpa [#allocation9], 1 }
 0x25b   :  { %1642 = vsyncpa [#allocation5], 1 }
 0x25c   :  { %1644 = vsyncpa [#allocation5 + $0x1], 1 }
 0x25d   :  { %1645 = vsyncpa [#allocation6], 1 }
 0x25e   :  { %1647 = vsyncpa [#allocation6 + $0x1], 1 }

</bundles_post_ra>
